<compile_context>
chip_gen: v7x
topology: tpu7x:2x2x1
jax: 0.10.0
libtpu: 0.0.40
codegen_flags: <defaults>
</compile_context>

<pallas_src>
import jax
import jax.numpy as jnp
from jax.experimental import pallas as pl
from jax.experimental.pallas import tpu as pltpu

HIDDEN = 20                 # logical hidden width of each GCNConv
HP = 128                    # lane-padded hidden width (multiple of 128)
A_DTYPE = jnp.bfloat16      # streamed adjacency / aggregation-operand dtype (tiled paths)
# TODO(synk): int8 (v5e/v6e) or fp8-e4m3 (v7x) A_hat with per-row scales would halve the
# dominant HBM stream again; omitted pending accuracy validation at target graph sizes.


# ----------------------------------------------------------------------------
# Small utilities
# ----------------------------------------------------------------------------
def _round_up(x, m):
    return (x + m - 1) // m * m


def _pad2(a, rows, cols):
    return jnp.zeros((rows, cols), jnp.float32).at[:a.shape[0], :a.shape[1]].set(
        a.astype(jnp.float32))


def _vmem_capacity_bytes():
    """Per-core VMEM capacity (generation aware); conservative fallback."""
    try:
        info = pltpu.get_tpu_info()
        for attr in ("vmem_capacity_bytes", "vmem_size_bytes", "vmem_bytes"):
            v = getattr(info, attr, None)
            if v:
                return int(v)
    except Exception:
        pass
    return 64 << 20          # v7x per-TensorCore VMEM (smallest current generation)


def _vmem_limit(need_bytes, cap):
    """Declared limit = real need + headroom, never below the 32 MiB default,
    never above ~92% of physical VMEM."""
    return int(min(max(int(need_bytes) + (8 << 20), 32 << 20), int(cap * 0.92)))


_SINGLE_BUFFER_OK = None


def _single_buffering_supported():
    """Probe (construction + lowering + run) for pipeline_mode=pl.Buffered(1)."""
    global _SINGLE_BUFFER_OK
    if _SINGLE_BUFFER_OK is not None:
        return _SINGLE_BUFFER_OK
    try:
        def _probe_kernel(x_ref, y_ref, o_ref):
            o_ref[...] = x_ref[...] + y_ref[...]

        out = pl.pallas_call(
            _probe_kernel,
            out_shape=jax.ShapeDtypeStruct((16, 128), jnp.float32),
            grid=(2,),
            in_specs=[pl.BlockSpec((8, 128), lambda i: (i, 0)),
                      pl.BlockSpec((8, 128), lambda i: (0, 0),
                                   pipeline_mode=pl.Buffered(1))],
            out_specs=pl.BlockSpec((8, 128), lambda i: (i, 0)),
        )(jnp.ones((16, 128), jnp.float32), jnp.ones((8, 128), jnp.float32))
        jax.block_until_ready(out)
        _SINGLE_BUFFER_OK = True
    except Exception:
        _SINGLE_BUFFER_OK = False
    return _SINGLE_BUFFER_OK


def _inv_spec(shape, index_map):
    """BlockSpec for a grid-invariant operand; single-buffered when supported."""
    if _single_buffering_supported():
        return pl.BlockSpec(shape, index_map, pipeline_mode=pl.Buffered(1))
    return pl.BlockSpec(shape, index_map)


# ----------------------------------------------------------------------------
# Kernels
# ----------------------------------------------------------------------------
def _node_gcn_resident_kernel(a_ref, x_ref, w1_ref, b1_ref, w2_ref, b2_ref,
                              w3_ref, b3_ref, wl1_ref, wl2_ref, wl3_ref, bl_ref,
                              out_ref):
    """Whole-graph kernel: A_hat read once and reused by all 3 aggregations."""
    a = a_ref[...]

    def layer(h, w_ref, b_ref):
        hw = jnp.dot(h, w_ref[...], preferred_element_type=jnp.float32)
        agg = jnp.dot(a, hw.astype(a.dtype),
                      preferred_element_type=jnp.float32) + b_ref[...]
        # F.normalize(p=2, dim=1): x / max(||x||, 1e-12) == x * rsqrt(max(ss, 1e-24))
        ss = jnp.sum(agg * agg, axis=1, keepdims=True)
        return jnp.maximum(agg * jax.lax.rsqrt(jnp.maximum(ss, 1e-24)), 0.0)

    h1 = layer(x_ref[...], w1_ref, b1_ref)
    h2 = layer(h1, w2_ref, b2_ref)
    h3 = layer(h2, w3_ref, b3_ref)
    # concat([h1,h2,h3]) @ Wl == h1 @ Wl1 + h2 @ Wl2 + h3 @ Wl3  (no (N,384) buffer)
    out_ref[...] = (jnp.dot(h1, wl1_ref[...], preferred_element_type=jnp.float32)
                    + jnp.dot(h2, wl2_ref[...], preferred_element_type=jnp.float32)
                    + jnp.dot(h3, wl3_ref[...], preferred_element_type=jnp.float32)
                    + bl_ref[...])


def _hw_kernel(h_ref, w_ref, o_ref):
    """HW = (h @ W) pre-cast to the aggregation operand dtype (row-tiled tiny GEMM)."""
    o_ref[...] = jnp.dot(h_ref[...], w_ref[...],
                         preferred_element_type=jnp.float32).astype(o_ref.dtype)


def _agg_layer_kernel(a_ref, hw_ref, b_ref, o_ref):
    """One GCN layer for a row block: a_ref (TM, Np) bf16 streamed, hw_ref resident."""
    agg = jnp.dot(a_ref[...], hw_ref[...],
                  preferred_element_type=jnp.float32) + b_ref[...]
    ss = jnp.sum(agg * agg, axis=1, keepdims=True)
    o_ref[...] = jnp.maximum(agg * jax.lax.rsqrt(jnp.maximum(ss, 1e-24)), 0.0)


def _agg_final_kernel(a_ref, hw3_ref, b3_ref, h1_ref, h2_ref,
                      wl1_ref, wl2_ref, wl3_ref, bl_ref, o_ref):
    """Layer 3 aggregation fused with the split (3x K=128) linear head, per row block."""
    agg = jnp.dot(a_ref[...], hw3_ref[...],
                  preferred_element_type=jnp.float32) + b3_ref[...]
    ss = jnp.sum(agg * agg, axis=1, keepdims=True)
    h3 = jnp.maximum(agg * jax.lax.rsqrt(jnp.maximum(ss, 1e-24)), 0.0)
    o_ref[...] = (jnp.dot(h1_ref[...], wl1_ref[...], preferred_element_type=jnp.float32)
                  + jnp.dot(h2_ref[...], wl2_ref[...], preferred_element_type=jnp.float32)
                  + jnp.dot(h3, wl3_ref[...], preferred_element_type=jnp.float32)
                  + bl_ref[...])


def _agg_layer2d_kernel(a_ref, hw_ref, b_ref, o_ref, acc_ref):
    """2-D (row, K) tiled GCN layer with an f32 accumulator (VMEM independent of Np)."""
    k = pl.program_id(1)

    @pl.when(k == 0)
    def _():
        acc_ref[...] = jnp.zeros_like(acc_ref)

    acc_ref[...] += jnp.dot(a_ref[...], hw_ref[...],
                            preferred_element_type=jnp.float32)

    @pl.when(k == pl.num_programs(1) - 1)
    def _():
        agg = acc_ref[...] + b_ref[...]
        ss = jnp.sum(agg * agg, axis=1, keepdims=True)
        o_ref[...] = jnp.maximum(agg * jax.lax.rsqrt(jnp.maximum(ss, 1e-24)), 0.0)


def _final_linear_kernel(h1_ref, h2_ref, h3_ref, wl1_ref, wl2_ref, wl3_ref,
                         bl_ref, o_ref):
    """Row-tiled split linear head (used by the 2-D path)."""
    o_ref[...] = (jnp.dot(h1_ref[...], wl1_ref[...], preferred_element_type=jnp.float32)
                  + jnp.dot(h2_ref[...], wl2_ref[...], preferred_element_type=jnp.float32)
                  + jnp.dot(h3_ref[...], wl3_ref[...], preferred_element_type=jnp.float32)
                  + bl_ref[...])


# ----------------------------------------------------------------------------
# Glue: normalized adjacency, parameter init / padding
# ----------------------------------------------------------------------------
def build_normalized_adjacency(edge_index, edge_weights, num_nodes):
    """Dense D^-1/2 (A + remaining self loops) D^-1/2 from COO edges (plain-JAX glue)."""
    # TODO(synk): the COO scatter-add has no clean rectangular-tile Pallas expression;
    # at very large graph sizes this dense A_hat should become block-sparse tiles fed
    # through scalar-prefetched per-row offsets.
    ew = edge_weights.astype(jnp.float32)
    src, dst = edge_index[0], edge_index[1]
    is_loop = src == dst
    # Off-diagonal scatter-add: A[target, source] += w.
    a = jnp.zeros((num_nodes, num_nodes), jnp.float32).at[dst, src].add(
        jnp.where(is_loop, 0.0, ew))
    # PyG add_remaining_self_loops: keep existing self-loop weights, fill 1.0 where
    # absent (duplicate self-loops are summed here; negligible glue-level difference).
    loop_w = jnp.zeros((num_nodes,), jnp.float32).at[src].add(
        jnp.where(is_loop, ew, 0.0))
    has_loop = jnp.zeros((num_nodes,), jnp.float32).at[src].add(
        is_loop.astype(jnp.float32)) > 0
    a = a + jnp.diag(jnp.where(has_loop, loop_w, 1.0))
    deg = a.sum(axis=1)
    dinv = jnp.where(deg > 0, jax.lax.rsqrt(deg), 0.0)
    return dinv[:, None] * a * dinv[None, :]


def init_params(key, num_features, num_classes):
    ks = jax.random.split(key, 8)
    scale = 0.1
    return {
        "w1": scale * jax.random.normal(ks[0], (num_features, HIDDEN), jnp.float32),
        "b1": scale * jax.random.normal(ks[1], (1, HIDDEN), jnp.float32),
        "w2": scale * jax.random.normal(ks[2], (HIDDEN, HIDDEN), jnp.float32),
        "b2": scale * jax.random.normal(ks[3], (1, HIDDEN), jnp.float32),
        "w3": scale * jax.random.normal(ks[4], (HIDDEN, HIDDEN), jnp.float32),
        "b3": scale * jax.random.normal(ks[5], (1, HIDDEN), jnp.float32),
        "wl": scale * jax.random.normal(ks[6], (3 * HIDDEN, num_classes), jnp.float32),
        "bl": scale * jax.random.normal(ks[7], (1, num_classes), jnp.float32),
    }


def _pad_inputs(a_hat, x, params, n_pad, f_pad, c_pad, a_dtype):
    """Lane/sublane-dense padding; padded rows/cols are exact no-ops for the math."""
    n, f = x.shape
    nc = params["wl"].shape[1]
    a_pad = jnp.zeros((n_pad, n_pad), jnp.float32).at[:n, :n].set(a_hat).astype(a_dtype)
    x_pad = jnp.zeros((n_pad, f_pad), jnp.float32).at[:n, :f].set(x.astype(jnp.float32))
    wl = params["wl"].astype(jnp.float32)
    wl1 = jnp.zeros((HP, c_pad), jnp.float32).at[:HIDDEN, :nc].set(wl[:HIDDEN])
    wl2 = jnp.zeros((HP, c_pad), jnp.float32).at[:HIDDEN, :nc].set(wl[HIDDEN:2 * HIDDEN])
    wl3 = jnp.zeros((HP, c_pad), jnp.float32).at[:HIDDEN, :nc].set(wl[2 * HIDDEN:3 * HIDDEN])
    return {
        "a": a_pad, "x": x_pad,
        "w1": _pad2(params["w1"], f_pad, HP), "b1": _pad2(params["b1"], 1, HP),
        "w2": _pad2(params["w2"], HP, HP), "b2": _pad2(params["b2"], 1, HP),
        "w3": _pad2(params["w3"], HP, HP), "b3": _pad2(params["b3"], 1, HP),
        "wl1": wl1, "wl2": wl2, "wl3": wl3, "bl": _pad2(params["bl"], 1, c_pad),
    }


# ----------------------------------------------------------------------------
# Path-specific forwards
# ----------------------------------------------------------------------------
def _forward_resident(p, n_pad, f_pad, c_pad, cap):
    asz = jnp.dtype(p["a"].dtype).itemsize
    need = (n_pad * n_pad * asz + n_pad * (f_pad + 6 * HP + c_pad) * 4
            + (f_pad * HP + 2 * HP * HP + 3 * HP * c_pad + 8 * HP + c_pad) * 4)
    flops = (2 * n_pad * f_pad * HP + 4 * n_pad * HP * HP
             + 3 * 2 * n_pad * n_pad * HP + 3 * 2 * n_pad * HP * c_pad)
    bytes_acc = (n_pad * n_pad * asz + n_pad * (f_pad + c_pad) * 4
                 + (f_pad * HP + 2 * HP * HP + 3 * HP * c_pad) * 4)
    vspec = pl.BlockSpec(memory_space=pltpu.MemorySpace.VMEM)
    return pl.pallas_call(
        _node_gcn_resident_kernel,
        out_shape=jax.ShapeDtypeStruct((n_pad, c_pad), jnp.float32),
        in_specs=[vspec] * 12,
        out_specs=vspec,
        compiler_params=pltpu.CompilerParams(vmem_limit_bytes=_vmem_limit(need, cap)),
        cost_estimate=pl.CostEstimate(flops=int(flops), transcendentals=int(3 * n_pad),
                                      bytes_accessed=int(bytes_acc)),
    )(p["a"], p["x"], p["w1"], p["b1"], p["w2"], p["b2"], p["w3"], p["b3"],
      p["wl1"], p["wl2"], p["wl3"], p["bl"])


def _compute_hw(h, w, row_tile, cap):
    """Hoisted per-layer HW = (h @ W) cast to A_DTYPE (row-tiled, parallel grid)."""
    n, k = h.shape
    hp = w.shape[1]
    hw_bufs = 1 if _single_buffering_supported() else 2
    need = 2 * row_tile * k * 4 + hw_bufs * k * hp * 4 + 2 * row_tile * hp * 2
    return pl.pallas_call(
        _hw_kernel,
        out_shape=jax.ShapeDtypeStruct((n, hp), A_DTYPE),
        grid=(n // row_tile,),
        in_specs=[pl.BlockSpec((row_tile, k), lambda i: (i, 0)),
                  _inv_spec((k, hp), lambda i: (0, 0))],
        out_specs=pl.BlockSpec((row_tile, hp), lambda i: (i, 0)),
        compiler_params=pltpu.CompilerParams(dimension_semantics=("parallel",),
                                             vmem_limit_bytes=_vmem_limit(need, cap)),
        cost_estimate=pl.CostEstimate(
            flops=int(2 * n * k * hp), transcendentals=0,
            bytes_accessed=int(n * k * 4 + k * hp * 4 + n * hp * 2)),
    )(h, w)


def _pick_row_tile(num_nodes, c_pad, budget, hw_bufs):
    """Largest row block whose 1-D-path working set fits `budget`.

    Returns (tm, n_pad, fits). n_pad is decoupled from 128-divisibility: we pad up to
    a multiple of TM as long as the extra zero rows stay <= ~12.5% of the graph."""
    asz = jnp.dtype(A_DTYPE).itemsize
    np0 = _round_up(max(num_nodes, 8), 128)
    for tm in (2048, 1024, 512, 256, 128):
        n_pad = _round_up(max(num_nodes, tm), tm)
        if n_pad > max(np0 + np0 // 8, np0 + 128):
            continue
        est = (2 * tm * n_pad * asz                 # streamed A row block (2 buffers)
               + hw_bufs * n_pad * HP * asz         # resident bf16 HW
               + 2 * tm * HP * 4 * 3                # h1/h2 blocks + layer output block
               + 2 * tm * c_pad * 4                 # final output block
               + hw_bufs * (3 * HP * c_pad + 4 * HP + c_pad) * 4)
        if est <= budget:
            return tm, n_pad, True
    return 128, np0, False


def _forward_rows(p, n_pad, tm, c_pad, cap):
    """1-D row-streamed path: (TM, Np) bf16 A blocks over a parallel grid; the only
    resident operand per layer is the hoisted (Np, HP) bf16 HW."""
    asz = jnp.dtype(A_DTYPE).itemsize
    hw_bufs = 1 if _single_buffering_supported() else 2
    hw_tile = tm if tm < 512 else 512
    nblk = n_pad // tm

    def layer_call(hw, b):
        need = (2 * tm * n_pad * asz + hw_bufs * n_pad * HP * asz
                + 2 * tm * HP * 4 + hw_bufs * HP * 4)
        return pl.pallas_call(
            _agg_layer_kernel,
            out_shape=jax.ShapeDtypeStruct((n_pad, HP), jnp.float32),
            grid=(nblk,),
            in_specs=[pl.BlockSpec((tm, n_pad), lambda i: (i, 0)),    # streamed A rows
                      _inv_spec((n_pad, HP), lambda i: (0, 0)),       # resident HW
                      _inv_spec((1, HP), lambda i: (0, 0))],          # bias
            out_specs=pl.BlockSpec((tm, HP), lambda i: (i, 0)),
            compiler_params=pltpu.CompilerParams(dimension_semantics=("parallel",),
                                                 vmem_limit_bytes=_vmem_limit(need, cap)),
            cost_estimate=pl.CostEstimate(
                flops=int(2 * n_pad * n_pad * HP), transcendentals=int(n_pad),
                bytes_accessed=int(n_pad * n_pad * asz + n_pad * HP * asz
                                   + n_pad * HP * 4)),
        )(p["a"], hw, b)

    hw1 = _compute_hw(p["x"], p["w1"], hw_tile, cap)
    h1 = layer_call(hw1, p["b1"])
    hw2 = _compute_hw(h1, p["w2"], hw_tile, cap)
    h2 = layer_call(hw2, p["b2"])
    hw3 = _compute_hw(h2, p["w3"], hw_tile, cap)

    need = (2 * tm * n_pad * asz + hw_bufs * n_pad * HP * asz
            + 2 * tm * HP * 4 * 2 + 2 * tm * c_pad * 4
            + hw_bufs * (3 * HP * c_pad + HP + c_pad) * 4)
    return pl.pallas_call(
        _agg_final_kernel,
        out_shape=jax.ShapeDtypeStruct((n_pad, c_pad), jnp.float32),
        grid=(nblk,),
        in_specs=[pl.BlockSpec((tm, n_pad), lambda i: (i, 0)),        # streamed A rows
                  _inv_spec((n_pad, HP), lambda i: (0, 0)),           # resident HW3
                  _inv_spec((1, HP), lambda i: (0, 0)),               # b3
                  pl.BlockSpec((tm, HP), lambda i: (i, 0)),           # h1 block
                  pl.BlockSpec((tm, HP), lambda i: (i, 0)),           # h2 block
                  _inv_spec((HP, c_pad), lambda i: (0, 0)),           # wl1
                  _inv_spec((HP, c_pad), lambda i: (0, 0)),           # wl2
                  _inv_spec((HP, c_pad), lambda i: (0, 0)),           # wl3
                  _inv_spec((1, c_pad), lambda i: (0, 0))],           # bl
        out_specs=pl.BlockSpec((tm, c_pad), lambda i: (i, 0)),
        compiler_params=pltpu.CompilerParams(dimension_semantics=("parallel",),
                                             vmem_limit_bytes=_vmem_limit(need, cap)),
        cost_estimate=pl.CostEstimate(
            flops=int(2 * n_pad * n_pad * HP + 3 * 2 * n_pad * HP * c_pad),
            transcendentals=int(n_pad),
            bytes_accessed=int(n_pad * n_pad * asz + n_pad * HP * asz
                               + 2 * n_pad * HP * 4 + 3 * HP * c_pad * 4
                               + n_pad * c_pad * 4)),
    )(p["a"], hw3, p["b3"], h1, h2, p["wl1"], p["wl2"], p["wl3"], p["bl"])


def _forward_rows_k(p, n_pad, tile, c_pad, cap):
    """2-D (row, K)-tiled path: VMEM independent of Np; f32 accumulator scratch."""
    asz = jnp.dtype(A_DTYPE).itemsize
    hw_bufs = 1 if _single_buffering_supported() else 2
    nblk = n_pad // tile

    def layer_call(hw, b):
        need = (2 * tile * tile * asz + 2 * tile * HP * asz + tile * HP * 4
                + 2 * tile * HP * 4 + hw_bufs * HP * 4)
        return pl.pallas_call(
            _agg_layer2d_kernel,
            out_shape=jax.ShapeDtypeStruct((n_pad, HP), jnp.float32),
            grid=(nblk, nblk),
            in_specs=[pl.BlockSpec((tile, tile), lambda i, k: (i, k)),  # A (row, K) tile
                      pl.BlockSpec((tile, HP), lambda i, k: (k, 0)),    # HW K tile
                      _inv_spec((1, HP), lambda i, k: (0, 0))],         # bias
            out_specs=pl.BlockSpec((tile, HP), lambda i, k: (i, 0)),
            scratch_shapes=[pltpu.VMEM((tile, HP), jnp.float32)],
            compiler_params=pltpu.CompilerParams(
                dimension_semantics=("parallel", "arbitrary"),
                vmem_limit_bytes=_vmem_limit(need, cap)),
            cost_estimate=pl.CostEstimate(
                flops=int(2 * n_pad * n_pad * HP), transcendentals=int(n_pad),
                bytes_accessed=int(n_pad * n_pad * asz + nblk * n_pad * HP * asz
                                   + n_pad * HP * 4)),
        )(p["a"], hw, b)

    hw1 = _compute_hw(p["x"], p["w1"], tile, cap)
    h1 = layer_call(hw1, p["b1"])
    hw2 = _compute_hw(h1, p["w2"], tile, cap)
    h2 = layer_call(hw2, p["b2"])
    hw3 = _compute_hw(h2, p["w3"], tile, cap)
    h3 = layer_call(hw3, p["b3"])

    need = (2 * tile * HP * 4 * 3 + 2 * tile * c_pad * 4
            + hw_bufs * (3 * HP * c_pad + c_pad) * 4)
    return pl.pallas_call(
        _final_linear_kernel,
        out_shape=jax.ShapeDtypeStruct((n_pad, c_pad), jnp.float32),
        grid=(nblk,),
        in_specs=[pl.BlockSpec((tile, HP), lambda i: (i, 0)),
                  pl.BlockSpec((tile, HP), lambda i: (i, 0)),
                  pl.BlockSpec((tile, HP), lambda i: (i, 0)),
                  _inv_spec((HP, c_pad), lambda i: (0, 0)),
                  _inv_spec((HP, c_pad), lambda i: (0, 0)),
                  _inv_spec((HP, c_pad), lambda i: (0, 0)),
                  _inv_spec((1, c_pad), lambda i: (0, 0))],
        out_specs=pl.BlockSpec((tile, c_pad), lambda i: (i, 0)),
        compiler_params=pltpu.CompilerParams(dimension_semantics=("parallel",),
                                             vmem_limit_bytes=_vmem_limit(need, cap)),
        cost_estimate=pl.CostEstimate(
            flops=int(3 * 2 * n_pad * HP * c_pad), transcendentals=0,
            bytes_accessed=int(3 * n_pad * HP * 4 + 3 * HP * c_pad * 4
                               + n_pad * c_pad * 4)),
    )(h1, h2, h3, p["wl1"], p["wl2"], p["wl3"], p["bl"])


# ----------------------------------------------------------------------------
# Public forward
# ----------------------------------------------------------------------------
def node_gcn_forward(x, edge_index, params, edge_weights=None, force_path=None):
    """force_path in {None, 'resident', 'rows', 'rows_k'} (None = auto-select)."""
    num_nodes, num_feat = x.shape
    num_classes = params["wl"].shape[1]
    if edge_weights is None:
        edge_weights = jnp.ones((edge_index.shape[1],), jnp.float32)

    a_hat = build_normalized_adjacency(edge_index, edge_weights, num_nodes)

    f_pad = _round_up(max(num_feat, 1), 128)
    c_pad = _round_up(max(num_classes, 1), 128)
    np0 = _round_up(max(num_nodes, 8), 128)

    cap = _vmem_capacity_bytes()
    budget = int(cap * 0.85)
    hw_bufs = 1 if _single_buffering_supported() else 2

    def resident_need(asz):
        return (np0 * np0 * asz + np0 * (f_pad + 6 * HP + c_pad) * 4
                + (f_pad * HP + 2 * HP * HP + 3 * HP * c_pad + 8 * HP + c_pad) * 4)

    path = force_path
    if path is None:
        if resident_need(4) <= budget or resident_need(2) <= budget:
            path = "resident"
        else:
            _, _, fits = _pick_row_tile(num_nodes, c_pad, budget, hw_bufs)
            path = "rows" if fits else "rows_k"

    if path == "resident":
        # Keep A in f32 when it fits (read once from HBM -> no bandwidth penalty).
        a_dtype = jnp.float32 if resident_need(4) <= budget else A_DTYPE
        p = _pad_inputs(a_hat, x, params, np0, f_pad, c_pad, a_dtype)
        out = _forward_resident(p, np0, f_pad, c_pad, cap)
    elif path == "rows":
        tm, n_pad, _ = _pick_row_tile(num_nodes, c_pad, budget, hw_bufs)
        p = _pad_inputs(a_hat, x, params, n_pad, f_pad, c_pad, A_DTYPE)
        out = _forward_rows(p, n_pad, tm, c_pad, cap)
    else:  # "rows_k"
        tile = 256 if np0 <= 2048 else 512
        n_pad = _round_up(max(num_nodes, tile), tile)
        p = _pad_inputs(a_hat, x, params, n_pad, f_pad, c_pad, A_DTYPE)
        out = _forward_rows_k(p, n_pad, tile, c_pad, cap)

    return out[:num_nodes, :num_classes]


def node_gcn_reference(x, edge_index, params, edge_weights=None):
    """Pure-JAX f32 reference (mirrors the PyTorch module)."""
    n = x.shape[0]
    if edge_weights is None:
        edge_weights = jnp.ones((edge_index.shape[1],), jnp.float32)
    a = build_normalized_adjacency(edge_index, edge_weights, n)

    def layer(h, w, b):
        agg = a @ (h @ w) + b
        nrm = jnp.sqrt(jnp.sum(agg * agg, axis=1, keepdims=True))
        return jnp.maximum(agg / jnp.maximum(nrm, 1e-12), 0.0)

    h1 = layer(x.astype(jnp.float32), params["w1"], params["b1"])
    h2 = layer(h1, params["w2"], params["b2"])
    h3 = layer(h2, params["w3"], params["b3"])
    return jnp.concatenate([h1, h2, h3], axis=1) @ params["wl"] + params["bl"]


if __name__ == "__main__":
    key = jax.random.PRNGKey(0)
    k1, k2, k3, k4, k5, k6 = jax.random.split(key, 6)

    # --- small graph: auto-selects the VMEM-resident path (A_hat in f32, read once) ---
    n_nodes, n_feat, n_cls, n_edges = 16, 8, 4, 32
    x = jax.random.normal(k1, (n_nodes, n_feat), jnp.float32)
    edge_index = jax.random.randint(k2, (2, n_edges), 0, n_nodes, dtype=jnp.int32)
    params = init_params(k3, n_feat, n_cls)

    out = node_gcn_forward(x, edge_index, params)
    jax.block_until_ready(out)
    assert out.shape == (n_nodes, n_cls)
    ref = node_gcn_reference(x, edge_index, params)
    assert float(jnp.max(jnp.abs(out - ref))) < 0.05, "resident path mismatch"

    # --- medium graph forced onto the 1-D row-streamed and 2-D (row, K) paths ---
    n_nodes2, n_feat2, n_cls2, n_edges2 = 600, 32, 6, 2400
    x2 = jax.random.normal(k4, (n_nodes2, n_feat2), jnp.float32)
    edge_index2 = jax.random.randint(k5, (2, n_edges2), 0, n_nodes2, dtype=jnp.int32)
    params2 = init_params(k6, n_feat2, n_cls2)
    ref2 = node_gcn_reference(x2, edge_index2, params2)

    out_rows = node_gcn_forward(x2, edge_index2, params2, force_path="rows")
    jax.block_until_ready(out_rows)
    assert out_rows.shape == (n_nodes2, n_cls2)
    assert float(jnp.max(jnp.abs(out_rows - ref2))) < 0.1, "row-streamed path mismatch"

    out_2d = node_gcn_forward(x2, edge_index2, params2, force_path="rows_k")
    jax.block_until_ready(out_2d)
    assert out_2d.shape == (n_nodes2, n_cls2)
    assert float(jnp.max(jnp.abs(out_2d - ref2))) < 0.1, "2-D tiled path mismatch"

    print("KERNEL_OK")
</pallas_src>

<mosaic_0001>
module attributes {stable_mosaic.version = 11 : i64} {
  func.func @_probe_kernel(%arg0: i32, %arg1: memref<8x128xf32, #tpu.memory_space<vmem>>, %arg2: memref<8x128xf32, #tpu.memory_space<vmem>>, %arg3: memref<8x128xf32, #tpu.memory_space<vmem>>) attributes {dimension_semantics = [#tpu.dimension_semantics<arbitrary>], iteration_bounds = array<i64: 2>, scalar_prefetch = 0 : i64, scratch_operands = 0 : i64, tpu.core_type = #tpu.core_type<tc>, window_params = [{transform_indices = @transform_0, window_bounds = array<i64: 8, 128>}, {pipeline_mode = #tpu.pipeline_mode<synchronous>, transform_indices = @transform_1, window_bounds = array<i64: 8, 128>}, {transform_indices = @transform_2, window_bounds = array<i64: 8, 128>}]} {
    %c0 = arith.constant 0 : index
    %c0_0 = arith.constant 0 : index
    %0 = vector.load %arg1[%c0, %c0_0] : memref<8x128xf32, #tpu.memory_space<vmem>>, vector<8x128xf32>
    %c0_1 = arith.constant 0 : index
    %c0_2 = arith.constant 0 : index
    %1 = vector.load %arg2[%c0_1, %c0_2] : memref<8x128xf32, #tpu.memory_space<vmem>>, vector<8x128xf32>
    %2 = arith.addf %0, %1 : vector<8x128xf32>
    %c0_3 = arith.constant 0 : index
    %c0_4 = arith.constant 0 : index
    %3 = vector.load %arg3[%c0_3, %c0_4] : memref<8x128xf32, #tpu.memory_space<vmem>>, vector<8x128xf32>
    tpu.vector_store %arg3[%c0_3, %c0_4], %2 {strides = array<i32>} : memref<8x128xf32, #tpu.memory_space<vmem>>, vector<8x128xf32>,
    return
  }
  func.func @transform_0(%arg0: i32) -> (i32, i32) {
    %c0_i32 = arith.constant 0 : i32
    %c0_i32_0 = arith.constant 0 : i32
    return %arg0, %c0_i32 : i32, i32
  }
  func.func @transform_1(%arg0: i32) -> (i32, i32) {
    %c0_i32 = arith.constant 0 : i32
    %c0_i32_0 = arith.constant 0 : i32
    %c0_i32_1 = arith.constant 0 : i32
    return %c0_i32, %c0_i32_0 : i32, i32
  }
  func.func @transform_2(%arg0: i32) -> (i32, i32) {
    %c0_i32 = arith.constant 0 : i32
    %c0_i32_0 = arith.constant 0 : i32
    return %arg0, %c0_i32 : i32, i32
  }
}

module attributes {stable_mosaic.version = 11 : i64} {
  func.func @_node_gcn_resident_kernel(%arg0: memref<128x128xf32, #tpu.memory_space<vmem>>, %arg1: memref<128x128xf32, #tpu.memory_space<vmem>>, %arg2: memref<128x128xf32, #tpu.memory_space<vmem>>, %arg3: memref<1x128xf32, #tpu.memory_space<vmem>>, %arg4: memref<128x128xf32, #tpu.memory_space<vmem>>, %arg5: memref<1x128xf32, #tpu.memory_space<vmem>>, %arg6: memref<128x128xf32, #tpu.memory_space<vmem>>, %arg7: memref<1x128xf32, #tpu.memory_space<vmem>>, %arg8: memref<128x128xf32, #tpu.memory_space<vmem>>, %arg9: memref<128x128xf32, #tpu.memory_space<vmem>>, %arg10: memref<128x128xf32, #tpu.memory_space<vmem>>, %arg11: memref<1x128xf32, #tpu.memory_space<vmem>>, %arg12: memref<128x128xf32, #tpu.memory_space<vmem>>) attributes {dimension_semantics = [], scalar_prefetch = 0 : i64, scratch_operands = 0 : i64, tpu.core_type = #tpu.core_type<tc>} {
    %c0 = arith.constant 0 : index
    %c0_0 = arith.constant 0 : index
    %0 = vector.load %arg0[%c0, %c0_0] : memref<128x128xf32, #tpu.memory_space<vmem>>, vector<128x128xf32>
    %c0_1 = arith.constant 0 : index
    %c0_2 = arith.constant 0 : index
    %1 = vector.load %arg1[%c0_1, %c0_2] : memref<128x128xf32, #tpu.memory_space<vmem>>, vector<128x128xf32>
    %c0_3 = arith.constant 0 : index
    %c0_4 = arith.constant 0 : index
    %2 = vector.load %arg2[%c0_3, %c0_4] : memref<128x128xf32, #tpu.memory_space<vmem>>, vector<128x128xf32>
    %cst = arith.constant dense<0.000000e+00> : vector<128x128xf32>
    %3 = tpu.matmul %1, %2, %cst {dimension_numbers = #tpu.dot_dimension_numbers<[1], [0], [0], [1], [0, 0, 1, 1], [], []>} : vector<128x128xf32>, vector<128x128xf32>, vector<128x128xf32> -> vector<128x128xf32>
    %cst_5 = arith.constant dense<0.000000e+00> : vector<128x128xf32>
    %4 = tpu.matmul %0, %3, %cst_5 {dimension_numbers = #tpu.dot_dimension_numbers<[1], [0], [0], [1], [0, 0, 1, 1], [], []>} : vector<128x128xf32>, vector<128x128xf32>, vector<128x128xf32> -> vector<128x128xf32>
    %c0_6 = arith.constant 0 : index
    %c0_7 = arith.constant 0 : index
    %5 = vector.load %arg3[%c0_6, %c0_7] : memref<1x128xf32, #tpu.memory_space<vmem>>, vector<1x128xf32>
    %6 = vector.broadcast %5 : vector<1x128xf32> to vector<128x128xf32>
    %7 = arith.addf %4, %6 : vector<128x128xf32>
    %8 = arith.mulf %7, %7 : vector<128x128xf32>
    %cst_8 = arith.constant dense<0.000000e+00> : vector<128xf32>
    %9 = vector.multi_reduction <add>, %8, %cst_8 [1] : vector<128x128xf32> to vector<128xf32>
    %10 = vector.shape_cast %9 : vector<128xf32> to vector<128x1xf32>
    %cst_9 = arith.constant 1.000000e-24 : f32
    %11 = vector.broadcast %cst_9 : f32 to vector<128x1xf32>
    %12 = arith.maximumf %10, %11 : vector<128x1xf32>
    %13 = math.rsqrt %12 : vector<128x1xf32>
    %14 = vector.broadcast %13 : vector<128x1xf32> to vector<128x128xf32>
    %15 = arith.mulf %7, %14 : vector<128x128xf32>
    %cst_10 = arith.constant 0.000000e+00 : f32
    %16 = vector.broadcast %cst_10 : f32 to vector<128x128xf32>
    %17 = arith.maximumf %15, %16 : vector<128x128xf32>
    %c0_11 = arith.constant 0 : index
    %c0_12 = arith.constant 0 : index
    %18 = vector.load %arg4[%c0_11, %c0_12] : memref<128x128xf32, #tpu.memory_space<vmem>>, vector<128x128xf32>
    %cst_13 = arith.constant dense<0.000000e+00> : vector<128x128xf32>
    %19 = tpu.matmul %17, %18, %cst_13 {dimension_numbers = #tpu.dot_dimension_numbers<[1], [0], [0], [1], [0, 0, 1, 1], [], []>} : vector<128x128xf32>, vector<128x128xf32>, vector<128x128xf32> -> vector<128x128xf32>
    %cst_14 = arith.constant dense<0.000000e+00> : vector<128x128xf32>
    %20 = tpu.matmul %0, %19, %cst_14 {dimension_numbers = #tpu.dot_dimension_numbers<[1], [0], [0], [1], [0, 0, 1, 1], [], []>} : vector<128x128xf32>, vector<128x128xf32>, vector<128x128xf32> -> vector<128x128xf32>
    %c0_15 = arith.constant 0 : index
    %c0_16 = arith.constant 0 : index
    %21 = vector.load %arg5[%c0_15, %c0_16] : memref<1x128xf32, #tpu.memory_space<vmem>>, vector<1x128xf32>
    %22 = vector.broadcast %21 : vector<1x128xf32> to vector<128x128xf32>
    %23 = arith.addf %20, %22 : vector<128x128xf32>
    %24 = arith.mulf %23, %23 : vector<128x128xf32>
    %cst_17 = arith.constant dense<0.000000e+00> : vector<128xf32>
    %25 = vector.multi_reduction <add>, %24, %cst_17 [1] : vector<128x128xf32> to vector<128xf32>
    %26 = vector.shape_cast %25 : vector<128xf32> to vector<128x1xf32>
    %cst_18 = arith.constant 1.000000e-24 : f32
    %27 = vector.broadcast %cst_18 : f32 to vector<128x1xf32>
    %28 = arith.maximumf %26, %27 : vector<128x1xf32>
    %29 = math.rsqrt %28 : vector<128x1xf32>
    %30 = vector.broadcast %29 : vector<128x1xf32> to vector<128x128xf32>
    %31 = arith.mulf %23, %30 : vector<128x128xf32>
    %cst_19 = arith.constant 0.000000e+00 : f32
    %32 = vector.broadcast %cst_19 : f32 to vector<128x128xf32>
    %33 = arith.maximumf %31, %32 : vector<128x128xf32>
    %c0_20 = arith.constant 0 : index
    %c0_21 = arith.constant 0 : index
    %34 = vector.load %arg6[%c0_20, %c0_21] : memref<128x128xf32, #tpu.memory_space<vmem>>, vector<128x128xf32>
    %cst_22 = arith.constant dense<0.000000e+00> : vector<128x128xf32>
    %35 = tpu.matmul %33, %34, %cst_22 {dimension_numbers = #tpu.dot_dimension_numbers<[1], [0], [0], [1], [0, 0, 1, 1], [], []>} : vector<128x128xf32>, vector<128x128xf32>, vector<128x128xf32> -> vector<128x128xf32>
    %cst_23 = arith.constant dense<0.000000e+00> : vector<128x128xf32>
    %36 = tpu.matmul %0, %35, %cst_23 {dimension_numbers = #tpu.dot_dimension_numbers<[1], [0], [0], [1], [0, 0, 1, 1], [], []>} : vector<128x128xf32>, vector<128x128xf32>, vector<128x128xf32> -> vector<128x128xf32>
    %c0_24 = arith.constant 0 : index
    %c0_25 = arith.constant 0 : index
    %37 = vector.load %arg7[%c0_24, %c0_25] : memref<1x128xf32, #tpu.memory_space<vmem>>, vector<1x128xf32>
    %38 = vector.broadcast %37 : vector<1x128xf32> to vector<128x128xf32>
    %39 = arith.addf %36, %38 : vector<128x128xf32>
    %40 = arith.mulf %39, %39 : vector<128x128xf32>
    %cst_26 = arith.constant dense<0.000000e+00> : vector<128xf32>
    %41 = vector.multi_reduction <add>, %40, %cst_26 [1] : vector<128x128xf32> to vector<128xf32>
    %42 = vector.shape_cast %41 : vector<128xf32> to vector<128x1xf32>
    %cst_27 = arith.constant 1.000000e-24 : f32
    %43 = vector.broadcast %cst_27 : f32 to vector<128x1xf32>
    %44 = arith.maximumf %42, %43 : vector<128x1xf32>
    %45 = math.rsqrt %44 : vector<128x1xf32>
    %46 = vector.broadcast %45 : vector<128x1xf32> to vector<128x128xf32>
    %47 = arith.mulf %39, %46 : vector<128x128xf32>
    %cst_28 = arith.constant 0.000000e+00 : f32
    %48 = vector.broadcast %cst_28 : f32 to vector<128x128xf32>
    %49 = arith.maximumf %47, %48 : vector<128x128xf32>
    %c0_29 = arith.constant 0 : index
    %c0_30 = arith.constant 0 : index
    %50 = vector.load %arg8[%c0_29, %c0_30] : memref<128x128xf32, #tpu.memory_space<vmem>>, vector<128x128xf32>
    %cst_31 = arith.constant dense<0.000000e+00> : vector<128x128xf32>
    %51 = tpu.matmul %17, %50, %cst_31 {dimension_numbers = #tpu.dot_dimension_numbers<[1], [0], [0], [1], [0, 0, 1, 1], [], []>} : vector<128x128xf32>, vector<128x128xf32>, vector<128x128xf32> -> vector<128x128xf32>
    %c0_32 = arith.constant 0 : index
    %c0_33 = arith.constant 0 : index
    %52 = vector.load %arg9[%c0_32, %c0_33] : memref<128x128xf32, #tpu.memory_space<vmem>>, vector<128x128xf32>
    %cst_34 = arith.constant dense<0.000000e+00> : vector<128x128xf32>
    %53 = tpu.matmul %33, %52, %cst_34 {dimension_numbers = #tpu.dot_dimension_numbers<[1], [0], [0], [1], [0, 0, 1, 1], [], []>} : vector<128x128xf32>, vector<128x128xf32>, vector<128x128xf32> -> vector<128x128xf32>
    %54 = arith.addf %51, %53 : vector<128x128xf32>
    %c0_35 = arith.constant 0 : index
    %c0_36 = arith.constant 0 : index
    %55 = vector.load %arg10[%c0_35, %c0_36] : memref<128x128xf32, #tpu.memory_space<vmem>>, vector<128x128xf32>
    %cst_37 = arith.constant dense<0.000000e+00> : vector<128x128xf32>
    %56 = tpu.matmul %49, %55, %cst_37 {dimension_numbers = #tpu.dot_dimension_numbers<[1], [0], [0], [1], [0, 0, 1, 1], [], []>} : vector<128x128xf32>, vector<128x128xf32>, vector<128x128xf32> -> vector<128x128xf32>
    %57 = arith.addf %54, %56 : vector<128x128xf32>
    %c0_38 = arith.constant 0 : index
    %c0_39 = arith.constant 0 : index
    %58 = vector.load %arg11[%c0_38, %c0_39] : memref<1x128xf32, #tpu.memory_space<vmem>>, vector<1x128xf32>
    %59 = vector.broadcast %58 : vector<1x128xf32> to vector<128x128xf32>
    %60 = arith.addf %57, %59 : vector<128x128xf32>
    %c0_40 = arith.constant 0 : index
    %c0_41 = arith.constant 0 : index
    %61 = vector.load %arg12[%c0_40, %c0_41] : memref<128x128xf32, #tpu.memory_space<vmem>>, vector<128x128xf32>
    tpu.vector_store %arg12[%c0_40, %c0_41], %60 {strides = array<i32>} : memref<128x128xf32, #tpu.memory_space<vmem>>, vector<128x128xf32>,
    return
  }
}

</mosaic_0001>

<bundles_post_ra>
// kernel: tpu_custom_call.1
= control target key start
LH: loop header
LB: loop body
LE: loop exit
PB: predicated region body
PF: predicated region fallthrough
CT: control target
= control target key end

     0   :  { %7 = vsyncpa [#allocation3], 0  ;;  %s690_s0 = inlined_call_operand.hbm [shape: f32[16,128], index: 0, kind: input, shape index: {}]   ;;  %s691_s1 = inlined_call_operand.hbm [shape: f32[8,128], index: 1, kind: input, shape index: {}]   ;;  %s692_s2 = inlined_call_operand.hbm [shape: f32[16,128], index: 2, kind: output, shape index: {}]  }
   0x1   :  { %9 = vsyncpa [#allocation3 + $0x1], 0 }
   0x2   :  { %10 = vsyncpa [#allocation6], 0 }
   0x3   :  { %11 = vsyncpa [#allocation4], 0 }
   0x4   :  { %13 = vsyncpa [#allocation4 + $0x1], 0  ;;  %s489_s9 = smov 0   ;;  %s491_s10 = smov 0  }
   0x5   :  { %s493_s11 = smov 0   ;;  %s495_s12 = smov 0  }
   0x6 LB: > { %s510_s13 = sadd.s32 4294967295, %s469_s12   ;;  %s270_s14 = sadd.s32 4294967294, %s469_s12   ;;  %s469_s12 = sphi %s495_s12, %s716_s12   ;;  %s465_s11 = sphi %s493_s11, %s715_s11   ;;  %s461_s10 = sphi %s491_s10, %s714_s10   ;;  %s457_s9 = sphi %s489_s9, %s713_s9  }
   0x7   : > { %p39_p0 = scmp.ne.s32.totalorder %s461_s10, %s457_s9  ;;  %p693_p1 = scmp.eq.s32.totalorder %s510_s13, 0 }
   0x8   : > { %p90_p3 = scmp.eq.s32.totalorder %s270_s14, 1  ;;  %p271_p5 = scmp.ge.s32.totalorder %s469_s12, 1 }
   0x9   : > { %p519_p4 = por %p693_p1, %p39_p0  ;;  %p97_p7 = scmp.lt.s32.totalorder %s469_s12, 3 }
   0xa   : > { %p524_p6 = por %p90_p3, %p39_p0  ;;  %s471_s18 = smov [#allocation5]  }
   0xb   : > { %s696_s15 = scalar_select %p519_p4, 1, 0 }
   0xc   : > { %s697_s16 = scalar_select %p524_p6, 1, 0 }
   0xd   : > { %p529_p8 = pnand %p271_p5, %p97_p7  ;;  %s110_s19 = sshll.u32 %s471_s18, 4  ;;  %s111_s19 = int_to_ptr.vmem [resolvable:$true] %s110_s19 }
   0xe   : > { %s537_s20 = sadd.s32 1, %s469_s12   ;;  %s26_s24 = sadd.s32 1, %s465_s11 }
   0xf   : > { %s698_s17 = scalar_select %p529_p8, 1, 0 }
  0x10   : > { %p292_p10 = pneg %p529_p8  ;;  %s23_s22 = ssub.s32 %s469_s12, %s537_s20 }
  0x11   : > { %p547_p12 = scmp.eq.s32.totalorder %s23_s22, 0  ;;  %s341_s27 = scalar_lea.hbm %s691_s1, 128 }
  0x12   : > { %p541_p11 = pnand %p292_p10, %p693_p1  ;;  %p342_p0 = scmp.ne.s32.totalorder %s691_s1, %s341_s27 }
  0x13   : > { %s700_s23 = scalar_select %p547_p12, 1, 0 }
  0x14   : > { %p343_p3 = pneg %p541_p11  ;;  %p348_p10 = scmp.lt.u32.totalorder %s341_s27, %s691_s1 }
  0x16   : > { %p344_p5 = pnand %p343_p3, %p342_p0 }
  0x18   : > { %p345_p7 = pneg %p344_p5 }
  0x1a   : > { %p350_p9 = pnand %p348_p10, %p345_p7 }
  0x1c   : > { %353 = shalt.err (!%p350_p9)
}
  0x1d   : > { %s354_s4 = scalar_lea.vmem %s111_s19, 128  ;;  %p362_p6 = scmp.lt.s32.totalorder %s111_s19, %s111_s19 }
  0x1e   : > { %p355_p1 = scmp.ne.s32.totalorder %s111_s19, %s354_s4  ;;  %p363_p4 = scmp.lt.s32.totalorder %s354_s4, %s354_s4 }
  0x20   : > { %p357_p2 = pnand %p355_p1, %p343_p3  ;;  %p364_p8 = por %p363_p4, %p362_p6 }
  0x22   : > { %p358_p13 = pneg %p357_p2 }
  0x24   : > { %p365_p12 = pnand %p364_p8, %p358_p13 }
  0x26   : > { %368 = shalt.err (!%p365_p12)
}
  0x27   : > { %295 = dma.hbm_to_vmem [thread:$0]  (!%p541_p11), %s691_s1, 128, %s111_s19, [#allocation6]  }
  0x28   : > { %p701_p1 = scmp.ne.s32.totalorder %s700_s23, 0  ;;  %p34_p2 = scmp.eq.s32.totalorder %s469_s12, 0 }
  0x29   : > { %p702_p4 = scmp.ne.s32.totalorder %s465_s11, %s461_s10  ;;  %p703_p6 = scmp.eq.s32.totalorder %s510_s13, 1 }
  0x2a   : > { %s573_s7 = scalar_select %p701_p1, %s465_s11, %s26_s24  }
  0x2b   : > { %p581_p8 = por %p703_p6, %p702_p4  ;;  %p305_p9 = scmp.lt.s32.totalorder %s469_s12, 2 }
  0x2c   : > { %s121_s14 = sand.u32 1, %s465_s11   ;;  %p705_p12 = pmov %p702_p4 }
  0x2d   : > { %s274_s18 = sshll.u32 %s121_s14, 3  ;;  %s275_s21 = sshll.u32 %s469_s12, 7 }
  0x2e   : > { %p35_p13 = por %p34_p2, %p705_p12  ;;  %s594_s19 = scalar_lea.hbm %s690_s0, %s275_s21 }
  0x2f   : > { %s125_s23 = scalar_lea.vmem [#allocation2], %s274_s18  ;;  %s122_s27 = scalar_lea.sflag [#allocation3], %s121_s14 }
  0x30   : > { %s132_s24 = sshll.u32 %s125_s23, 4  ;;  %p596_p11 = pnand %p305_p9, %p35_p13  ;;  %s600_s24 = int_to_ptr.vmem [resolvable:$true] %s132_s24 }
  0x31   : > { %s369_s28 = scalar_lea.hbm %s594_s19, 128  ;;  %s374_s3 = scalar_lea.hbm %s690_s0, 256 }
  0x32   : > { %p370_p0 = scmp.ne.s32.totalorder %s594_s19, %s369_s28  ;;  %p371_p3 = pneg %p596_p11 }
  0x33   : > { %p375_p10 = scmp.lt.u32.totalorder %s594_s19, %s690_s0  ;;  %p376_p1 = scmp.lt.u32.totalorder %s374_s3, %s369_s28 }
  0x34   : > { %p372_p5 = pnand %p371_p3, %p370_p0  ;;  %p378_p4 = scmp.lt.u32.totalorder %s369_s28, %s594_s19 }
  0x35   : > { %p377_p2 = por %p376_p1, %p375_p10 }
  0x36   : > { %p373_p7 = pneg %p372_p5 }
  0x37   : > { %p379_p6 = por %p378_p4, %p377_p2 }
  0x39   : > { %p380_p9 = pnand %p379_p6, %p373_p7 }
  0x3b   : > { %383 = shalt.err (!%p380_p9)
}
  0x3c   : > { %s384_s6 = scalar_lea.vmem %s600_s24, 128  ;;  %s472_s14 = smov [#allocation2]  }
  0x3d   : > { %p385_p12 = scmp.ne.s32.totalorder %s600_s24, %s384_s6  ;;  %s389_s18 = sshll.u32 %s472_s14, 4  ;;  %s390_s18 = int_to_ptr.vmem [resolvable:$false] %s389_s18 }
  0x3e   : > { %s391_s21 = scalar_lea.vmem %s390_s18, 256  ;;  %p392_p5 = scmp.lt.s32.totalorder %s600_s24, %s390_s18 }
  0x3f   : > { %p387_p13 = pnand %p385_p12, %p371_p3  ;;  %p393_p10 = scmp.lt.s32.totalorder %s391_s21, %s384_s6 }
  0x41   : > { %p388_p0 = pneg %p387_p13  ;;  %p394_p1 = por %p393_p10, %p392_p5 }
  0x43   : > { %p395_p2 = pnand %p394_p1, %p388_p0 }
  0x45   : > { %398 = shalt.err (!%p395_p2)
}
  0x46   : > { %299 = dma.hbm_to_vmem [thread:$0]  (!%p596_p11), %s594_s19, 128, %s600_s24, %s122_s27  }
  0x47   : > { %p707_p7 = scmp.ne.s32.totalorder %s698_s17, 0 }
  0x48   : > { %s630_s22 = sand.u32 (!%p707_p7), 1, %s461_s10   ;;  %p708_p3 = scmp.ne.s32.totalorder (!%p707_p7), %s696_s15, 0 }
  0x49   : > { %141 = sbr.rel (%p707_p7) target bundleno = 109 (0x6d), region = 28  ;;  %s277_s25 = sshll.u32 (!%p707_p7), %s630_s22, 3 }
  0x4a   : > { %s144_s23 = scalar_lea.sflag (!%p707_p7), [#allocation3], %s630_s22  ;;  %s147_s28 = scalar_lea.vmem (!%p707_p7), [#allocation2], %s277_s25 }
  0x50   : > { %444 = dma.done.wait (%p708_p3), %s144_s23, 128  }
  0x51   : > { %446 = vsyncadd (%p708_p3), %s144_s23, 4294967168  ;;  %p709_p4 = scmp.eq.s32.totalorder %s510_s13, 0 }
  0x53   : > { %448 = dma.done.wait (%p709_p4), [#allocation6], 128   ;;  %p710_p11 = pmov %p709_p4 }
  0x54   : > { %s171_s17 = scalar_lea.vmem [#allocation7], %s277_s25  ;;  %s281_s24 = sshll.u32 %s510_s13, 7  ;;  %v172_v0 = vld [vmem:[%s147_s28] sm:$0xff]  ;;  %v173_v1 = vld [vmem:[#allocation5] sm:$0xff] }
  0x55   : > { %450 = vsyncadd (%p710_p11), [#allocation6], 4294967168  ;;  %s190_s19 = sshll.u32 %s171_s17, 4  ;;  %v174_v2 = vadd.f32 %v173_v1, %v172_v0  ;;  %s648_s27 = scalar_lea.hbm %s692_s2, %s281_s24  ;;  %s643_s19 = int_to_ptr.vmem [resolvable:$true] %s190_s19 }
  0x56   : > { %s177_s29 = scalar_lea.sflag [#allocation4], %s630_s22  ;;  %s399_s30 = scalar_lea.vmem %s643_s19, 128 }
  0x57   : > { %175 = vst [vmem:[%s171_s17] sm:$0xff] %v174_v2  ;;  %p400_p6 = scmp.ne.s32.totalorder %s643_s19, %s399_s30  ;;  %s473_s13 = smov [#allocation7]  }
  0x58   : > { %s403_s3 = sshll.u32 %s473_s13, 4  ;;  %s404_s3 = int_to_ptr.vmem [resolvable:$false] %s403_s3 }
  0x59   : > { %p401_p9 = pnand %p400_p6, %p581_p8  ;;  %s405_s4 = scalar_lea.vmem %s404_s3, 256 }
  0x5a   : > { %p406_p13 = scmp.lt.s32.totalorder %s643_s19, %s404_s3  ;;  %p407_p0 = scmp.lt.s32.totalorder %s405_s4, %s399_s30 }
  0x5b   : > { %p402_p12 = pneg %p401_p9 }
  0x5c   : > { %p408_p5 = por %p407_p0, %p406_p13 }
  0x5e   : > { %p409_p10 = pnand %p408_p5, %p402_p12 }
  0x60   : > { %412 = shalt.err (!%p409_p10)
}
  0x61   : > { %s413_s5 = scalar_lea.hbm %s648_s27, 128  ;;  %s417_s18 = scalar_lea.hbm %s692_s2, 256 }
  0x62   : > { %p414_p1 = scmp.ne.s32.totalorder %s648_s27, %s413_s5  ;;  %p418_p3 = scmp.lt.u32.totalorder %s648_s27, %s692_s2 }
  0x63   : > { %p419_p4 = scmp.lt.u32.totalorder %s417_s18, %s413_s5  ;;  %p421_p6 = scmp.lt.u32.totalorder %s413_s5, %s648_s27 }
  0x64   : > { %p415_p2 = pnand %p414_p1, %p581_p8 }
  0x65   : > { %p420_p11 = por %p419_p4, %p418_p3 }
  0x66   : > { %p416_p7 = pneg %p415_p2 }
  0x67   : > { %p422_p9 = por %p421_p6, %p420_p11 }
  0x69   : > { %p423_p12 = pnand %p422_p9, %p416_p7 }
  0x6b   : > { %426 = shalt.err (!%p423_p12)
}
  0x6c   : > { %290 = dma.vmem_to_hbm [thread:$0]  (%p581_p8), %s643_s19, 128, %s648_s27, %s177_s29  }
  0x6d PF: > { %s202_s25 = sand.u32 1, %s457_s9   ;;  %p711_p13 = scmp.ne.s32.totalorder %s697_s16, 0 }
  0x6e   : > { %p712_p0 = scmp.ge.s32.totalorder %s469_s12, 2  ;;  %s203_s23 = scalar_lea.sflag [#allocation4], %s202_s25 }
  0x70   : > { %p301_p5 = pnand %p712_p0, %p711_p13 }
  0x72   : > { %452 = dma.done.wait (!%p301_p5), %s203_s23, 128  }
  0x73   : > { %454 = vsyncadd (!%p301_p5), %s203_s23, 4294967168  ;;  %p16_p10 = scmp.ge.s32.totalorder %s537_s20, 4   ;;  %s713_s9 = smov %s461_s10 }
  0x74   : > { %s714_s10 = smov %s465_s11  ;;  %s715_s11 = smov %s573_s7 }
  0x75   : > { %s716_s12 = smov %s537_s20  ;;  %18 = sbr.rel (!%p16_p10) target bundleno = 6 (0x6), region = 77 }
  0x7c   :  { %208 = vsyncpa [#allocation3], 1 }
  0x7d   :  { %210 = vsyncpa [#allocation3 + $0x1], 1 }
  0x7e   :  { %211 = vsyncpa [#allocation6], 1 }
  0x7f   :  { %212 = vsyncpa [#allocation4], 1 }
  0x80   :  { %214 = vsyncpa [#allocation4 + $0x1], 1 }

// kernel: tpu_custom_call.1
= control target key start
LH: loop header
LB: loop body
LE: loop exit
PB: predicated region body
PF: predicated region fallthrough
CT: control target
= control target key end

     0   :  { %17 = vsyncpa [#allocation3], 0  ;;  %s4324_s0 = inlined_call_operand.hbm [shape: f32[128,128], index: 0, kind: input, shape index: {}]   ;;  %s4325_s1 = inlined_call_operand.hbm [shape: f32[128,128], index: 1, kind: input, shape index: {}]   ;;  %s4326_s2 = inlined_call_operand.hbm [shape: f32[128,128], index: 2, kind: input, shape index: {}]   ;;  %s4327_s3 = inlined_call_operand.vmem [shape: f32[1,128], index: 3, kind: input, shape index: {}]   ;;  %s4328_s4 = inlined_call_operand.hbm [shape: f32[128,128], index: 4, kind: input, shape index: {}]   ;;  %s4329_s5 = inlined_call_operand.vmem [shape: f32[1,128], index: 5, kind: input, shape index: {}]   ;;  %s4330_s6 = inlined_call_operand.hbm [shape: f32[128,128], index: 6, kind: input, shape index: {}]   ;;  %s4331_s7 = inlined_call_operand.vmem [shape: f32[1,128], index: 7, kind: input, shape index: {}]   ;;  %s4332_s8 = inlined_call_operand.hbm [shape: f32[128,128], index: 8, kind: input, shape index: {}]   ;;  %s4333_s9 = inlined_call_operand.hbm [shape: f32[128,128], index: 9, kind: input, shape index: {}]   ;;  %s4334_s10 = inlined_call_operand.hbm [shape: f32[128,128], index: 10, kind: input, shape index: {}]   ;;  %s4335_s11 = inlined_call_operand.vmem [shape: f32[1,128], index: 11, kind: input, shape index: {}]   ;;  %s4336_s12 = inlined_call_operand.hbm [shape: f32[128,128], index: 12, kind: output, shape index: {}]  }
   0x1   :  { %18 = vsyncpa [#allocation6], 0 }
   0x2   :  { %19 = vsyncpa [#allocation9], 0 }
   0x3   :  { %20 = vsyncpa [#allocation12], 0 }
   0x4   :  { %21 = vsyncpa [#allocation15], 0 }
   0x5   :  { %22 = vsyncpa [#allocation4], 0  ;;  %s3481_s21 = smov [#allocation5]   ;;  %s3482_s23 = smov [#allocation8]  }
   0x6   :  { %s40_s22 = sshll.u32 %s3481_s21, 4  ;;  %s66_s24 = sshll.u32 %s3482_s23, 4  ;;  %s41_s22 = int_to_ptr.vmem [resolvable:$true] %s40_s22  ;;  %s3557_s24 = int_to_ptr.vmem [resolvable:$true] %s66_s24 }
   0x7   :  { %s3271_s27 = scalar_lea.hbm %s4325_s1, 2048 }
   0x8   :  { %p3272_p0 = scmp.ne.s32.totalorder %s4325_s1, %s3271_s27  ;;  %p3275_p1 = scmp.lt.u32.totalorder %s3271_s27, %s4325_s1 }
   0xa   :  { %p3277_p2 = pnand %p3275_p1, %p3272_p0 }
   0xc   :  { %3280 = shalt.err (!%p3277_p2)
}
   0xd   :  { %s3281_s14 = scalar_lea.vmem %s41_s22, 2048  ;;  %p3286_p4 = scmp.lt.s32.totalorder %s41_s22, %s41_s22 }
   0xe   :  { %p3282_p3 = scmp.ne.s32.totalorder %s41_s22, %s3281_s14  ;;  %p3287_p5 = scmp.lt.s32.totalorder %s3281_s14, %s3281_s14 }
  0x10   :  { %p3288_p6 = por %p3287_p5, %p3286_p4 }
  0x12   :  { %p3289_p7 = pnand %p3288_p6, %p3282_p3 }
  0x14   :  { %3292 = shalt.err (!%p3289_p7)
}
  0x15   :  { %s3483_s15 = smov 128   ;;  %s3484_s16 = smov 8  }
  0x16   :  { %46 = dma.hbm_to_vmem [thread:$0]  %s4325_s1, 2048, %s41_s22, [#allocation6], %s3483_s15, %s3483_s15, %s3484_s16  }
  0x17   :  { %s3293_s21 = scalar_lea.hbm %s4328_s4, 2048 }
  0x18   :  { %p3294_p8 = scmp.ne.s32.totalorder %s4328_s4, %s3293_s21  ;;  %p3297_p9 = scmp.lt.u32.totalorder %s3293_s21, %s4328_s4 }
  0x1a   :  { %p3299_p10 = pnand %p3297_p9, %p3294_p8 }
  0x1c   :  { %3302 = shalt.err (!%p3299_p10)
}
  0x1d   :  { %s3303_s28 = scalar_lea.vmem %s3557_s24, 2048  ;;  %p3308_p12 = scmp.lt.s32.totalorder %s3557_s24, %s3557_s24 }
  0x1e   :  { %p3304_p11 = scmp.ne.s32.totalorder %s3557_s24, %s3303_s28  ;;  %p3309_p13 = scmp.lt.s32.totalorder %s3303_s28, %s3303_s28 }
  0x20   :  { %p3310_p0 = por %p3309_p13, %p3308_p12 }
  0x22   :  { %p3311_p1 = pnand %p3310_p0, %p3304_p11 }
  0x24   :  { %3314 = shalt.err (!%p3311_p1)
}
  0x25   :  { %72 = dma.hbm_to_vmem [thread:$0]  %s4328_s4, 2048, %s3557_s24, [#allocation9], %s3483_s15, %s3483_s15, %s3484_s16  }
  0x26   :  { %s3485_s29 = smov [#allocation11]   ;;  %s3486_s13 = smov [#allocation2]  }
  0x27   :  { %s94_s30 = sshll.u32 %s3485_s29, 4  ;;  %s28_s14 = sshll.u32 %s3486_s13, 4  ;;  %s95_s30 = int_to_ptr.vmem [resolvable:$true] %s94_s30  ;;  %s3594_s14 = int_to_ptr.vmem [resolvable:$true] %s28_s14 }
  0x28   :  { %s3315_s19 = scalar_lea.hbm %s4332_s8, 2048 }
  0x29   :  { %p3316_p2 = scmp.ne.s32.totalorder %s4332_s8, %s3315_s19  ;;  %p3319_p3 = scmp.lt.u32.totalorder %s3315_s19, %s4332_s8 }
  0x2b   :  { %p3321_p4 = pnand %p3319_p3, %p3316_p2 }
  0x2d   :  { %3324 = shalt.err (!%p3321_p4)
}
  0x2e   :  { %s3325_s4 = scalar_lea.vmem %s95_s30, 2048  ;;  %p3330_p6 = scmp.lt.s32.totalorder %s95_s30, %s95_s30 }
  0x2f   :  { %p3326_p5 = scmp.ne.s32.totalorder %s95_s30, %s3325_s4  ;;  %p3331_p7 = scmp.lt.s32.totalorder %s3325_s4, %s3325_s4 }
  0x31   :  { %p3332_p8 = por %p3331_p7, %p3330_p6 }
  0x33   :  { %p3333_p9 = pnand %p3332_p8, %p3326_p5 }
  0x35   :  { %3336 = shalt.err (!%p3333_p9)
}
  0x36   :  { %100 = dma.hbm_to_vmem [thread:$0]  %s4332_s8, 2048, %s95_s30, [#allocation12], %s3483_s15, %s3483_s15, %s3484_s16  }
  0x37   :  { %s3337_s1 = scalar_lea.hbm %s4324_s0, 2048 }
  0x38   :  { %p3338_p10 = scmp.ne.s32.totalorder %s4324_s0, %s3337_s1  ;;  %p3341_p11 = scmp.lt.u32.totalorder %s3337_s1, %s4324_s0 }
  0x3a   :  { %p3343_p12 = pnand %p3341_p11, %p3338_p10 }
  0x3c   :  { %3346 = shalt.err (!%p3343_p12)
}
  0x3d   :  { %s3347_s18 = scalar_lea.vmem %s3594_s14, 2048  ;;  %p3352_p0 = scmp.lt.s32.totalorder %s3594_s14, %s3594_s14 }
  0x3e   :  { %p3348_p13 = scmp.ne.s32.totalorder %s3594_s14, %s3347_s18  ;;  %p3353_p1 = scmp.lt.s32.totalorder %s3347_s18, %s3347_s18 }
  0x40   :  { %p3354_p2 = por %p3353_p1, %p3352_p0 }
  0x42   :  { %p3355_p3 = pnand %p3354_p2, %p3348_p13 }
  0x44   :  { %3358 = shalt.err (!%p3355_p3)
}
  0x45   :  { %34 = dma.hbm_to_vmem [thread:$0]  %s4324_s0, 2048, %s3594_s14, [#allocation3], %s3483_s15, %s3483_s15, %s3484_s16  }
  0x46   :  { %s3487_s19 = smov [#allocation7]   ;;  %s3488_s21 = smov [#allocation10]  }
  0x47   :  { %s52_s20 = sshll.u32 %s3487_s19, 4  ;;  %s80_s23 = sshll.u32 %s3488_s21, 4  ;;  %s53_s20 = int_to_ptr.vmem [resolvable:$true] %s52_s20  ;;  %s3631_s23 = int_to_ptr.vmem [resolvable:$true] %s80_s23 }
  0x48   :  { %s3359_s24 = scalar_lea.hbm %s4326_s2, 2048 }
  0x49   :  { %p3360_p4 = scmp.ne.s32.totalorder %s4326_s2, %s3359_s24  ;;  %p3363_p5 = scmp.lt.u32.totalorder %s3359_s24, %s4326_s2 }
  0x4b   :  { %p3365_p6 = pnand %p3363_p5, %p3360_p4 }
  0x4d   :  { %3368 = shalt.err (!%p3365_p6)
}
  0x4e   :  { %s3369_s0 = scalar_lea.vmem %s53_s20, 2048  ;;  %p3374_p8 = scmp.lt.s32.totalorder %s53_s20, %s53_s20 }
  0x4f   :  { %p3370_p7 = scmp.ne.s32.totalorder %s53_s20, %s3369_s0  ;;  %p3375_p9 = scmp.lt.s32.totalorder %s3369_s0, %s3369_s0 }
  0x51   :  { %p3376_p10 = por %p3375_p9, %p3374_p8 }
  0x53   :  { %p3377_p11 = pnand %p3376_p10, %p3370_p7 }
  0x55   :  { %3380 = shalt.err (!%p3377_p11)
}
  0x56   :  { %58 = dma.hbm_to_vmem [thread:$0]  %s4326_s2, 2048, %s53_s20, [#allocation6], %s3483_s15, %s3483_s15, %s3484_s16  }
  0x57   :  { %s3381_s17 = scalar_lea.hbm %s4330_s6, 2048 }
  0x58   :  { %p3382_p12 = scmp.ne.s32.totalorder %s4330_s6, %s3381_s17  ;;  %p3385_p13 = scmp.lt.u32.totalorder %s3381_s17, %s4330_s6 }
  0x5a   :  { %p3387_p0 = pnand %p3385_p13, %p3382_p12 }
  0x5c   :  { %3390 = shalt.err (!%p3387_p0)
}
  0x5d   :  { %s3391_s21 = scalar_lea.vmem %s3631_s23, 2048  ;;  %p3396_p2 = scmp.lt.s32.totalorder %s3631_s23, %s3631_s23 }
  0x5e   :  { %p3392_p1 = scmp.ne.s32.totalorder %s3631_s23, %s3391_s21  ;;  %p3397_p3 = scmp.lt.s32.totalorder %s3391_s21, %s3391_s21 }
  0x60   :  { %p3398_p4 = por %p3397_p3, %p3396_p2 }
  0x62   :  { %p3399_p5 = pnand %p3398_p4, %p3392_p1 }
  0x64   :  { %3402 = shalt.err (!%p3399_p5)
}
  0x65   :  { %86 = dma.hbm_to_vmem [thread:$0]  %s4330_s6, 2048, %s3631_s23, [#allocation9], %s3483_s15, %s3483_s15, %s3484_s16  }
  0x66   :  { %s3489_s25 = smov [#allocation13]   ;;  %s3490_s24 = smov [#allocation14]  }
  0x67   :  { %s106_s4 = sshll.u32 %s3489_s25, 4  ;;  %s118_s26 = sshll.u32 %s3490_s24, 4  ;;  %s107_s4 = int_to_ptr.vmem [resolvable:$true] %s106_s4  ;;  %s3668_s26 = int_to_ptr.vmem [resolvable:$true] %s118_s26 }
  0x68   :  { %s3403_s1 = scalar_lea.hbm %s4333_s9, 2048 }
  0x69   :  { %p3404_p6 = scmp.ne.s32.totalorder %s4333_s9, %s3403_s1  ;;  %p3407_p7 = scmp.lt.u32.totalorder %s3403_s1, %s4333_s9 }
  0x6b   :  { %p3409_p8 = pnand %p3407_p7, %p3404_p6 }
  0x6d   :  { %3412 = shalt.err (!%p3409_p8)
}
  0x6e   :  { %s3413_s6 = scalar_lea.vmem %s107_s4, 2048  ;;  %p3418_p10 = scmp.lt.s32.totalorder %s107_s4, %s107_s4 }
  0x6f   :  { %p3414_p9 = scmp.ne.s32.totalorder %s107_s4, %s3413_s6  ;;  %p3419_p11 = scmp.lt.s32.totalorder %s3413_s6, %s3413_s6 }
  0x71   :  { %p3420_p12 = por %p3419_p11, %p3418_p10 }
  0x73   :  { %p3421_p13 = pnand %p3420_p12, %p3414_p9 }
  0x75   :  { %3424 = shalt.err (!%p3421_p13)
}
  0x76   :  { %112 = dma.hbm_to_vmem [thread:$0]  %s4333_s9, 2048, %s107_s4, [#allocation12], %s3483_s15, %s3483_s15, %s3484_s16  }
  0x77   :  { %s3425_s8 = scalar_lea.hbm %s4334_s10, 2048 }
  0x78   :  { %p3426_p0 = scmp.ne.s32.totalorder %s4334_s10, %s3425_s8  ;;  %p3429_p1 = scmp.lt.u32.totalorder %s3425_s8, %s4334_s10 }
  0x7a   :  { %p3431_p2 = pnand %p3429_p1, %p3426_p0 }
  0x7c   :  { %3434 = shalt.err (!%p3431_p2)
}
  0x7d   :  { %s3435_s20 = scalar_lea.vmem %s3668_s26, 2048  ;;  %p3440_p4 = scmp.lt.s32.totalorder %s3668_s26, %s3668_s26 }
  0x7e   :  { %p3436_p3 = scmp.ne.s32.totalorder %s3668_s26, %s3435_s20  ;;  %p3441_p5 = scmp.lt.s32.totalorder %s3435_s20, %s3435_s20 }
  0x80   :  { %p3442_p6 = por %p3441_p5, %p3440_p4 }
  0x82   :  { %p3443_p7 = pnand %p3442_p6, %p3436_p3 }
  0x84   :  { %3446 = shalt.err (!%p3443_p7)
}
  0x85   :  { %124 = dma.hbm_to_vmem [thread:$0]  %s4334_s10, 2048, %s3668_s26, [#allocation15], %s3483_s15, %s3483_s15, %s3484_s16  }
  0x86   :  { %3469 = dma.done.wait [#allocation3], 2048  }
  0x87   :  { %3470 = vsyncadd [#allocation3], 4294965248 }
  0x88   :  { %3471 = dma.done.wait [#allocation6], 4096  }
  0x89   :  { %3472 = vsyncadd [#allocation6], 4294963200 }
  0x8a   :  { %3473 = dma.done.wait [#allocation9], 4096  }
  0x8b   :  { %3474 = vsyncadd [#allocation9], 4294963200 }
  0x8c   :  { %3475 = dma.done.wait [#allocation12], 4096  }
  0x8d   :  { %3476 = vsyncadd [#allocation12], 4294963200 }
  0x8e   :  { %3477 = dma.done.wait [#allocation15], 2048  }
  0x8f   :  { %3478 = vsyncadd [#allocation15], 4294965248  ;;  %v183_v0 = vld [vmem:[#allocation7] sm:$0xff]  ;;  %v184_v1 = vld [vmem:[#allocation7 + $0x8] sm:$0xff] }
  0x90   :  { %v185_v2 = vld [vmem:[#allocation7 + $0x10] sm:$0xff]  ;;  %v2813_v3 = vpack.c.bf16 %v184_v1, %v183_v0  ;;  %v186_v4 = vld [vmem:[#allocation7 + $0x18] sm:$0xff]  ;;  %v187_v6 = vld [vmem:[#allocation7 + $0x20] sm:$0xff] }
  0x91   :  { %v2817_v5 = vpack.c.bf16 %v186_v4, %v185_v2  ;;  %v188_v7 = vld [vmem:[#allocation7 + $0x28] sm:$0xff]  ;;  %v167_v9 = vld [vmem:[#allocation5] sm:$0xff]  ;;  %v189_v10 = vld [vmem:[#allocation7 + $0x30] sm:$0xff] }
  0x92   :  { %2814 = vmatprep.subr.bf16.mxu1 %v2813_v3  ;;  %v2821_v8 = vpack.c.bf16 %v188_v7, %v187_v6  ;;  %v190_v11 = vld [vmem:[#allocation7 + $0x38] sm:$0xff]  ;;  %2341 = vmatprep.mubr.f32.mxu1 %v167_v9  ;;  %v191_v13 = vld [vmem:[#allocation7 + $0x40] sm:$0xff]  ;;  %v192_v14 = vld [vmem:[#allocation7 + $0x48] sm:$0xff] }
  0x93   :  { %2816 = vmatpush3.bf16.msra.mxu1 %v2813_v3  ;;  %v2825_v12 = vpack.c.bf16 %v190_v11, %v189_v10  ;;  %v2829_v15 = vpack.c.bf16 %v192_v14, %v191_v13  ;;  %v193_v16 = vld [vmem:[#allocation7 + $0x50] sm:$0xff]  ;;  %v194_v17 = vld [vmem:[#allocation7 + $0x58] sm:$0xff]  ;;  %v195_v19 = vld [vmem:[#allocation7 + $0x60] sm:$0xff] }
  0x94   :  { %2818 = vmatprep.subr.bf16.mxu1 %v2817_v5  ;;  %v2833_v18 = vpack.c.bf16 %v194_v17, %v193_v16  ;;  %v196_v20 = vld [vmem:[#allocation7 + $0x68] sm:$0xff]  ;;  %v197_v22 = vld [vmem:[#allocation7 + $0x70] sm:$0xff]  ;;  %v198_v23 = vld [vmem:[#allocation7 + $0x78] sm:$0xff] }
  0x95   :  { %v2837_v21 = vpack.c.bf16 %v196_v20, %v195_v19  ;;  %v2841_v24 = vpack.c.bf16 %v198_v23, %v197_v22  ;;  %v168_v25 = vld [vmem:[#allocation5 + $0x8] sm:$0xff]  ;;  %v169_v26 = vld [vmem:[#allocation5 + $0x10] sm:$0xff]  ;;  %v170_v27 = vld [vmem:[#allocation5 + $0x18] sm:$0xff] }
  0x96   :  { %v171_v28 = vld [vmem:[#allocation5 + $0x20] sm:$0xff]  ;;  %v172_v29 = vld [vmem:[#allocation5 + $0x28] sm:$0xff]  ;;  %v173_v30 = vld [vmem:[#allocation5 + $0x30] sm:$0xff] }
  0x97   :  { %2820 = vmatpush3.bf16.msra.mxu1 %v2817_v5  ;;  %v174_v31 = vld [vmem:[#allocation5 + $0x38] sm:$0xff]  ;;  %v175_v32 = vld [vmem:[#allocation5 + $0x40] sm:$0xff]  ;;  %v176_v33 = vld [vmem:[#allocation5 + $0x48] sm:$0xff] }
  0x98   :  { %2822 = vmatprep.subr.bf16.mxu1 %v2821_v8  ;;  %v177_v34 = vld [vmem:[#allocation5 + $0x50] sm:$0xff]  ;;  %v178_v35 = vld [vmem:[#allocation5 + $0x58] sm:$0xff]  ;;  %v179_v36 = vld [vmem:[#allocation5 + $0x60] sm:$0xff] }
  0x99   :  { %v180_v37 = vld [vmem:[#allocation5 + $0x68] sm:$0xff]  ;;  %v181_v38 = vld [vmem:[#allocation5 + $0x70] sm:$0xff]  ;;  %v182_v39 = vld [vmem:[#allocation5 + $0x78] sm:$0xff] }
  0x9a   :  { %v3705_v40 = vld [vmem:[#allocation2] sm:$0xff]  ;;  %v3708_v1 = vld [vmem:[#allocation2 + $0x8] sm:$0xff]  ;;  %v3710_v2 = vld [vmem:[#allocation2 + $0x10] sm:$0xff] }
  0x9b   :  { %2824 = vmatpush3.bf16.msra.mxu1 %v2821_v8  ;;  %v3714_v3 = vld [vmem:[#allocation2 + $0x18] sm:$0xff]  ;;  %v3716_v4 = vld [vmem:[#allocation2 + $0x20] sm:$0xff]  ;;  %v3720_v5 = vld [vmem:[#allocation2 + $0x28] sm:$0xff] }
  0x9c   :  { %2826 = vmatprep.subr.bf16.mxu1 %v2825_v12  ;;  %v3722_v6 = vld [vmem:[#allocation2 + $0x30] sm:$0xff]  ;;  %v3726_v7 = vld [vmem:[#allocation2 + $0x38] sm:$0xff]  ;;  %v3728_v8 = vld [vmem:[#allocation2 + $0x40] sm:$0xff] }
  0x9d   :  { %v3732_v9 = vld [vmem:[#allocation2 + $0x48] sm:$0xff]  ;;  %v3734_v10 = vld [vmem:[#allocation2 + $0x50] sm:$0xff]  ;;  %v3738_v11 = vld [vmem:[#allocation2 + $0x58] sm:$0xff] }
  0x9e   :  { %v3744_v13 = vld [vmem:[#allocation2 + $0x68] sm:$0xff]  ;;  %v3746_v14 = vld [vmem:[#allocation2 + $0x70] sm:$0xff]  ;;  %v608_v16 = vld [vmem:[#allocation8] sm:$0xff] }
  0x9f   :  { %2828 = vmatpush3.bf16.msra.mxu1 %v2825_v12  ;;  %v3740_v12 = vld [vmem:[#allocation2 + $0x60] sm:$0xff]  ;;  %v609_v17 = vld [vmem:[#allocation8 + $0x8] sm:$0xff]  ;;  %v611_v20 = vld [vmem:[#allocation8 + $0x18] sm:$0xff] }
  0xa0   :  { %2830 = vmatprep.subr.bf16.mxu1 %v2829_v15  ;;  %v2877_v19 = vpack.c.bf16 %v609_v17, %v608_v16  ;;  %v612_v22 = vld [vmem:[#allocation8 + $0x20] sm:$0xff]  ;;  %v613_v23 = vld [vmem:[#allocation8 + $0x28] sm:$0xff] }
  0xa2   :  { %2878 = vmatprep.subr.bf16.mxu0 %v2877_v19 }
  0xa3   :  { %2832 = vmatpush3.bf16.msra.mxu1 %v2829_v15  ;;  %v3750_v15 = vld [vmem:[#allocation2 + $0x78] sm:$0xff]  ;;  %2880 = vmatpush3.bf16.msra.mxu0 %v2877_v19 }
  0xa4   :  { %2834 = vmatprep.subr.bf16.mxu1 %v2833_v18 }
  0xa7   :  { %2836 = vmatpush3.bf16.msra.mxu1 %v2833_v18  ;;  %v610_v18 = vld [vmem:[#allocation8 + $0x10] sm:$0xff] }
  0xa8   :  { %2838 = vmatprep.subr.bf16.mxu1 %v2837_v21 }
  0xab   :  { %2840 = vmatpush3.bf16.msra.mxu1 %v2837_v21  ;;  %v2881_v21 = vpack.c.bf16 %v611_v20, %v610_v18 }
  0xac   :  { %2842 = vmatprep.subr.bf16.mxu1 %v2841_v24 }
  0xad   :  { %2882 = vmatprep.subr.bf16.mxu0 %v2881_v21 }
  0xae   :  { %2884 = vmatpush3.bf16.msra.mxu0 %v2881_v21 }
  0xaf   :  { %2844 = vmatpush3.bf16.msra.mxu1 %v2841_v24  ;;  %v2885_v24 = vpack.c.bf16 %v613_v23, %v612_v22  ;;  %v618_v22 = vld [vmem:[#allocation8 + $0x50] sm:$0xff]  ;;  %v619_v23 = vld [vmem:[#allocation8 + $0x58] sm:$0xff] }
  0xb1   :  { %2886 = vmatprep.subr.bf16.mxu0 %v2885_v24 }
  0xb2   :  { %2342 = vmatmul.mubr.f32.vlgmr.msra.gmra.mrb[0].mxu1 %v168_v25  ;;  %2888 = vmatpush3.bf16.msra.mxu0 %v2885_v24  ;;  %v3757_v25 = vld [vmem:[%s4327_s3] ss:$0 sm:$0xff] }
  0xb3   :  { %2344 = vmatprep.mubr.f32.mxu1 %v169_v26 }
  0xb6   :  { %2345 = vmatmul.mubr.f32.gmra.mrb[2].mxu1 %v170_v27 }
  0xb7   :  { %2347 = vmatprep.mubr.f32.mxu1 %v171_v28 }
  0xba   :  { %2348 = vmatmul.mubr.f32.gmra.mrb[4].mxu1 %v172_v29 }
  0xbb   :  { %2350 = vmatprep.mubr.f32.mxu1 %v173_v30 }
  0xbe   :  { %2351 = vmatmul.mubr.f32.gmra.mrb[6].mxu1 %v174_v31 }
  0xbf   :  { %2353 = vmatprep.mubr.f32.mxu1 %v175_v32 }
  0xc2   :  { %2354 = vmatmul.mubr.f32.gmra.mrb[8].mxu1 %v176_v33 }
  0xc3   :  { %2356 = vmatprep.mubr.f32.mxu1 %v177_v34 }
  0xc6   :  { %2357 = vmatmul.mubr.f32.gmra.mrb[10].mxu1 %v178_v35 }
  0xc7   :  { %2359 = vmatprep.mubr.f32.mxu1 %v179_v36 }
  0xca   :  { %2360 = vmatmul.mubr.f32.gmra.mrb[12].mxu1 %v180_v37 }
  0xcb   :  { %2362 = vmatprep.mubr.f32.mxu1 %v181_v38 }
  0xce   :  { %2363 = vmatmul.mubr.f32.gmra.mrb[14].mxu1 %v182_v39 }
  0xcf   :  { %2397 = vmatprep.mubr.f32.mxu1 %v3705_v40 }
 0x185   :  { %v2343_v41 = vpop.f32.mrb[0].mxu1 }
 0x186   :  { %v265_v42 = vpop.f32.mrb[1].mxu1 }
 0x187   :  { %v2845_v43 = vpack.c.bf16 %v2343_v41, %v265_v42 }
 0x189   :  { %v2346_v44 = vpop.f32.mrb[2].mxu1  ;;  %2846 = vmatprep.subr.bf16.mxu1 %v2845_v43 }
 0x18a   :  { %v275_v45 = vpop.f32.mrb[3].mxu1  ;;  %2848 = vmatpush3.bf16.msra.mxu1 %v2845_v43 }
 0x18b   :  { %v2849_v46 = vpack.c.bf16 %v2346_v44, %v275_v45 }
 0x18d   :  { %v2349_v47 = vpop.f32.mrb[4].mxu1  ;;  %2850 = vmatprep.subr.bf16.mxu1 %v2849_v46 }
 0x18e   :  { %v285_v48 = vpop.f32.mrb[5].mxu1  ;;  %2852 = vmatpush3.bf16.msra.mxu1 %v2849_v46 }
 0x18f   :  { %v2853_v49 = vpack.c.bf16 %v2349_v47, %v285_v48 }
 0x191   :  { %v2352_v50 = vpop.f32.mrb[6].mxu1  ;;  %2854 = vmatprep.subr.bf16.mxu1 %v2853_v49 }
 0x192   :  { %v295_v51 = vpop.f32.mrb[7].mxu1  ;;  %2856 = vmatpush3.bf16.msra.mxu1 %v2853_v49 }
 0x193   :  { %v2857_v52 = vpack.c.bf16 %v2352_v50, %v295_v51 }
 0x195   :  { %v2355_v53 = vpop.f32.mrb[8].mxu1  ;;  %2858 = vmatprep.subr.bf16.mxu1 %v2857_v52 }
 0x196   :  { %v305_v54 = vpop.f32.mrb[9].mxu1  ;;  %2860 = vmatpush3.bf16.msra.mxu1 %v2857_v52 }
 0x197   :  { %v2861_v55 = vpack.c.bf16 %v2355_v53, %v305_v54  ;;  %v614_v53 = vld [vmem:[#allocation8 + $0x30] sm:$0xff]  ;;  %v615_v54 = vld [vmem:[#allocation8 + $0x38] sm:$0xff] }
 0x199   :  { %v2358_v56 = vpop.f32.mrb[10].mxu1  ;;  %2862 = vmatprep.subr.bf16.mxu1 %v2861_v55 }
 0x19a   :  { %v315_v57 = vpop.f32.mrb[11].mxu1  ;;  %2864 = vmatpush3.bf16.msra.mxu1 %v2861_v55  ;;  %v2889_v55 = vpack.c.bf16 %v615_v54, %v614_v53 }
 0x19b   :  { %v2865_v58 = vpack.c.bf16 %v2358_v56, %v315_v57 }
 0x19c   :  { %2890 = vmatprep.subr.bf16.mxu0 %v2889_v55 }
 0x19d   :  { %v2361_v59 = vpop.f32.mrb[12].mxu1  ;;  %2866 = vmatprep.subr.bf16.mxu1 %v2865_v58  ;;  %2892 = vmatpush3.bf16.msra.mxu0 %v2889_v55 }
 0x19e   :  { %v325_v60 = vpop.f32.mrb[13].mxu1  ;;  %2868 = vmatpush3.bf16.msra.mxu1 %v2865_v58 }
 0x19f   :  { %v2869_v61 = vpack.c.bf16 %v2361_v59, %v325_v60 }
 0x1a1   :  { %v2364_v62 = vpop.f32.mrb[14].mxu1  ;;  %2870 = vmatprep.subr.bf16.mxu1 %v2869_v61 }
 0x1a2   :  { %v335_v63 = vpop.f32.mrb[15].mxu1  ;;  %2872 = vmatpush3.bf16.msra.mxu1 %v2869_v61 }
 0x1a3   :  { %v2873_v0 = vpack.c.bf16 %v2364_v62, %v335_v63  ;;  %v616_v62 = vld [vmem:[#allocation8 + $0x40] sm:$0xff]  ;;  %v617_v63 = vld [vmem:[#allocation8 + $0x48] sm:$0xff] }
 0x1a4   :  { %v2893_v19 = vpack.c.bf16 %v617_v63, %v616_v62 }
 0x1a5   :  { %2874 = vmatprep.subr.bf16.mxu1 %v2873_v0 }
 0x1a6   :  { %2876 = vmatpush3.bf16.msra.mxu1 %v2873_v0  ;;  %2894 = vmatprep.subr.bf16.mxu0 %v2893_v19 }
 0x1a7   :  { %2896 = vmatpush3.bf16.msra.mxu0 %v2893_v19 }
 0x1a9   :  { %2398 = vmatmul.mubr.f32.vlgmr.msra.gmra.mrb[16].mxu1 %v3708_v1 }
 0x1aa   :  { %2400 = vmatprep.mubr.f32.mxu1 %v3710_v2 }
 0x1ad   :  { %2401 = vmatmul.mubr.f32.gmra.mrb[18].mxu1 %v3714_v3 }
 0x1ae   :  { %2403 = vmatprep.mubr.f32.mxu1 %v3716_v4 }
 0x1b1   :  { %2404 = vmatmul.mubr.f32.gmra.mrb[20].mxu1 %v3720_v5 }
 0x1b2   :  { %2406 = vmatprep.mubr.f32.mxu1 %v3722_v6 }
 0x1b5   :  { %2407 = vmatmul.mubr.f32.gmra.mrb[22].mxu1 %v3726_v7 }
 0x1b6   :  { %2409 = vmatprep.mubr.f32.mxu1 %v3728_v8 }
 0x1b9   :  { %2410 = vmatmul.mubr.f32.gmra.mrb[24].mxu1 %v3732_v9 }
 0x1ba   :  { %2412 = vmatprep.mubr.f32.mxu1 %v3734_v10 }
 0x1bd   :  { %2413 = vmatmul.mubr.f32.gmra.mrb[26].mxu1 %v3738_v11 }
 0x1be   :  { %2415 = vmatprep.mubr.f32.mxu1 %v3740_v12 }
 0x1c1   :  { %2416 = vmatmul.mubr.f32.gmra.mrb[28].mxu1 %v3744_v13 }
 0x1c2   :  { %2418 = vmatprep.mubr.f32.mxu1 %v3746_v14 }
 0x1c5   :  { %2419 = vmatmul.mubr.f32.gmra.mrb[30].mxu1 %v3750_v15 }
 0x1c6   :  { %2509 = vmatprep.mubr.f32.mxu1 %v3705_v40 }
 0x27c   :  { %v2399_v26 = vpop.f32.mrb[16].mxu1 }
 0x27d   :  { %v417_v27 = vpop.f32.mrb[17].mxu1  ;;  %v3763_v29 = vadd.f32 %v2399_v26, %v3757_v25 }
 0x27e   :  { %v3760_v28 = vadd.f32 %v3757_v25, %v417_v27 }
 0x27f   :  { %v497_v37 = vmul.f32 %v3763_v29, %v3763_v29 }
 0x280   :  { %v2402_v30 = vpop.f32.mrb[18].mxu1  ;;  %v496_v31 = vmul.f32 %v3760_v28, %v3760_v28 }
 0x281   :  { %v427_v32 = vpop.f32.mrb[19].mxu1  ;;  %v3771_v34 = vadd.f32 %v2402_v30, %v3757_v25 }
 0x282   :  { %v3768_v33 = vadd.f32 %v3757_v25, %v427_v32  ;;  %512 = vadd.xlane.f32.xlu0 %v496_v31  ;;  %v2897_v31 = vpack.c.bf16 %v619_v23, %v618_v22 }
 0x283   :  { %v499_v43 = vmul.f32 %v3771_v34, %v3771_v34 }
 0x284   :  { %v2405_v35 = vpop.f32.mrb[20].mxu1  ;;  %v498_v36 = vmul.f32 %v3768_v33, %v3768_v33  ;;  %2898 = vmatprep.subr.bf16.mxu0 %v2897_v31 }
 0x285   :  { %v437_v38 = vpop.f32.mrb[21].mxu1  ;;  %v3781_v41 = vadd.f32 %v2405_v35, %v3757_v25  ;;  %2900 = vmatpush3.bf16.msra.mxu0 %v2897_v31 }
 0x286   :  { %v3778_v39 = vadd.f32 %v3757_v25, %v437_v38  ;;  %516 = vadd.xlane.f32.xlu1 %v498_v36  ;;  %514 = vadd.xlane.f32.xlu0 %v497_v37  ;;  %v620_v36 = vld [vmem:[#allocation8 + $0x60] sm:$0xff]  ;;  %v621_v37 = vld [vmem:[#allocation8 + $0x68] sm:$0xff] }
 0x287   :  { %v501_v49 = vmul.f32 %v3781_v41, %v3781_v41 }
 0x288   :  { %v2408_v42 = vpop.f32.mrb[22].mxu1  ;;  %v500_v44 = vmul.f32 %v3778_v39, %v3778_v39 }
 0x289   :  { %v447_v45 = vpop.f32.mrb[23].mxu1  ;;  %v3791_v47 = vadd.f32 %v2408_v42, %v3757_v25 }
 0x28a   :  { %v3788_v46 = vadd.f32 %v3757_v25, %v447_v45  ;;  %518 = vadd.xlane.f32.xlu1 %v499_v43  ;;  %520 = vadd.xlane.f32.xlu0 %v500_v44  ;;  %v2901_v44 = vpack.c.bf16 %v621_v37, %v620_v36  ;;  %v622_v45 = vld [vmem:[#allocation8 + $0x70] sm:$0xff] }
 0x28b   :  { %v503_v58 = vmul.f32 %v3791_v47, %v3791_v47 }
 0x28c   :  { %v2411_v48 = vpop.f32.mrb[24].mxu1  ;;  %v502_v50 = vmul.f32 %v3788_v46, %v3788_v46  ;;  %2902 = vmatprep.subr.bf16.mxu0 %v2901_v44 }
 0x28d   :  { %v457_v51 = vpop.f32.mrb[25].mxu1  ;;  %v3801_v56 = vadd.f32 %v2411_v48, %v3757_v25  ;;  %v623_v48 = vld [vmem:[#allocation8 + $0x78] sm:$0xff]  ;;  %2904 = vmatpush3.bf16.msra.mxu0 %v2901_v44 }
 0x28e   :  { %v3798_v52 = vadd.f32 %v3757_v25, %v457_v51  ;;  %522 = vadd.xlane.f32.xlu1 %v501_v49  ;;  %524 = vadd.xlane.f32.xlu0 %v502_v50  ;;  %v2905_v50 = vpack.c.bf16 %v623_v48, %v622_v45 }
 0x28f   :  { %v505_v17 = vmul.f32 %v3801_v56, %v3801_v56 }
 0x290   :  { %v2414_v57 = vpop.f32.mrb[26].mxu1  ;;  %v504_v59 = vmul.f32 %v3798_v52, %v3798_v52  ;;  %2906 = vmatprep.subr.bf16.mxu0 %v2905_v50 }
 0x291   :  { %v467_v60 = vpop.f32.mrb[27].mxu1  ;;  %v3811_v0 = vadd.f32 %v2414_v57, %v3757_v25  ;;  %2908 = vmatpush3.bf16.msra.mxu0 %v2905_v50 }
 0x292   :  { %v3808_v61 = vadd.f32 %v3757_v25, %v467_v60  ;;  %526 = vadd.xlane.f32.xlu1 %v503_v58  ;;  %528 = vadd.xlane.f32.xlu0 %v504_v59 }
 0x293   :  { %v507_v27 = vmul.f32 %v3811_v0, %v3811_v0 }
 0x294   :  { %v2417_v16 = vpop.f32.mrb[28].mxu1  ;;  %v506_v18 = vmul.f32 %v3808_v61, %v3808_v61 }
 0x295   :  { %v477_v20 = vpop.f32.mrb[29].mxu1  ;;  %v3821_v24 = vadd.f32 %v2417_v16, %v3757_v25 }
 0x296   :  { %v3818_v21 = vadd.f32 %v3757_v25, %v477_v20  ;;  %530 = vadd.xlane.f32.xlu1 %v505_v17  ;;  %532 = vadd.xlane.f32.xlu0 %v506_v18 }
 0x297   :  { %v509_v42 = vmul.f32 %v3821_v24, %v3821_v24 }
 0x298   :  { %v2420_v26 = vpop.f32.mrb[30].mxu1  ;;  %v508_v30 = vmul.f32 %v3818_v21, %v3818_v21 }
 0x299   :  { %v487_v32 = vpop.f32.mrb[31].mxu1  ;;  %v3831_v38 = vadd.f32 %v2420_v26, %v3757_v25 }
 0x29a   :  { %v3828_v35 = vadd.f32 %v3757_v25, %v487_v32  ;;  %534 = vadd.xlane.f32.xlu1 %v507_v27  ;;  %536 = vadd.xlane.f32.xlu0 %v508_v30 }
 0x29b   :  { %v511_v49 = vmul.f32 %v3831_v38, %v3831_v38 }
 0x29c   :  { %v510_v43 = vmul.f32 %v3828_v35, %v3828_v35 }
 0x29e   :  { %538 = vadd.xlane.f32.xlu1 %v509_v42  ;;  %540 = vadd.xlane.f32.xlu0 %v510_v43 }
 0x2a2   :  { %542 = vadd.xlane.f32.xlu1 %v511_v49 }
 0x30f   :  { %v513_v25 = vpop.xlane.xlu0 %512 }
 0x310   :  { %v544_v51 = vmax.f32 %v513_v25, 1e-24 }
 0x312   :  { %3160 = vrsqrt.f32 %v544_v51 }
 0x313   :  { %v517_v53 = vpop.xlane.xlu1 %516  ;;  %v515_v54 = vpop.xlane.xlu0 %514 }
 0x314   :  { %v546_v55 = vmax.f32 %v517_v53, 1e-24  ;;  %v545_v57 = vmax.f32 %v515_v54, 1e-24 }
 0x316   :  { %3162 = vrsqrt.f32 %v546_v55 }
 0x317   :  { %3164 = vrsqrt.f32 %v545_v57  ;;  %v519_v58 = vpop.xlane.xlu1 %518  ;;  %v521_v59 = vpop.xlane.xlu0 %520 }
 0x318   :  { %v547_v60 = vmax.f32 %v519_v58, 1e-24  ;;  %v548_v62 = vmax.f32 %v521_v59, 1e-24 }
 0x31a   :  { %3166 = vrsqrt.f32 %v547_v60 }
 0x31b   :  { %3168 = vrsqrt.f32 %v548_v62  ;;  %v523_v63 = vpop.xlane.xlu1 %522  ;;  %v525_v16 = vpop.xlane.xlu0 %524 }
 0x31c   :  { %v3161_v17 = vpop.eup %3160  ;;  %v549_v18 = vmax.f32 %v523_v63, 1e-24  ;;  %v550_v19 = vmax.f32 %v525_v16, 1e-24 }
 0x31d   :  { %v3840_v20 = vmul.f32 %v3161_v17, %v3760_v28 }
 0x31e   :  { %3170 = vrsqrt.f32 %v549_v18 }
 0x31f   :  { %3172 = vrsqrt.f32 %v550_v19  ;;  %v527_v22 = vpop.xlane.xlu1 %526  ;;  %v529_v23 = vpop.xlane.xlu0 %528  ;;  %v592_v26 = vmax.f32 %v3840_v20, 0.0 }
 0x320   :  { %v3163_v27 = vpop.eup %3162  ;;  %v551_v30 = vmax.f32 %v527_v22, 1e-24  ;;  %v552_v31 = vmax.f32 %v529_v23, 1e-24 }
 0x321   :  { %v3165_v32 = vpop.eup %3164  ;;  %2453 = vmatprep.mubr.f32.mxu0 %v592_v26  ;;  %v3846_v36 = vmul.f32 %v3163_v27, %v3768_v33 }
 0x322   :  { %3174 = vrsqrt.f32 %v551_v30  ;;  %v3849_v28 = vmul.f32 %v3165_v32, %v3763_v29 }
 0x323   :  { %3176 = vrsqrt.f32 %v552_v31  ;;  %v531_v37 = vpop.xlane.xlu1 %530  ;;  %v533_v42 = vpop.xlane.xlu0 %532  ;;  %v594_v43 = vmax.f32 %v3846_v36, 0.0 }
 0x324   :  { %v3167_v44 = vpop.eup %3166  ;;  %v553_v45 = vmax.f32 %v531_v37, 1e-24  ;;  %v554_v48 = vmax.f32 %v533_v42, 1e-24  ;;  %v593_v49 = vmax.f32 %v3849_v28, 0.0 }
 0x325   :  { %v3169_v50 = vpop.eup %3168  ;;  %v3854_v25 = vmul.f32 %v3167_v44, %v3771_v34 }
 0x326   :  { %3178 = vrsqrt.f32 %v553_v45  ;;  %2454 = vmatmul.mubr.f32.vlgmr.msra.gmra.mrb[0].mxu0 %v593_v49  ;;  %v3859_v29 = vmul.f32 %v3169_v50, %v3778_v39 }
 0x327   :  { %3180 = vrsqrt.f32 %v554_v48  ;;  %2456 = vmatprep.mubr.f32.mxu0 %v594_v43  ;;  %v535_v33 = vpop.xlane.xlu1 %534  ;;  %v537_v51 = vpop.xlane.xlu0 %536  ;;  %v595_v53 = vmax.f32 %v3854_v25, 0.0 }
 0x328   :  { %v3171_v54 = vpop.eup %3170  ;;  %v555_v55 = vmax.f32 %v535_v33, 1e-24  ;;  %v556_v57 = vmax.f32 %v537_v51, 1e-24  ;;  %v4348_v34 = vmax.f32 %v3859_v29, 0.0 }
 0x329   :  { %v3173_v58 = vpop.eup %3172  ;;  %v3866_v59 = vmul.f32 %v3171_v54, %v3781_v41 }
 0x32a   :  { %3182 = vrsqrt.f32 %v555_v55  ;;  %2457 = vmatmul.mubr.f32.gmra.mrb[2].mxu0 %v595_v53  ;;  %v3871_v39 = vmul.f32 %v3173_v58, %v3788_v46 }
 0x32b   :  { %3184 = vrsqrt.f32 %v556_v57  ;;  %2459 = vmatprep.mubr.f32.mxu0 %v4348_v34  ;;  %v539_v60 = vpop.xlane.xlu1 %538  ;;  %v541_v62 = vpop.xlane.xlu0 %540  ;;  %v4347_v63 = vmax.f32 %v3866_v59, 0.0  ;;  %v1461_v34 = vld [vmem:[#allocation11 + $0x18] sm:$0xff] }
 0x32c   :  { %v3175_v16 = vpop.eup %3174  ;;  %v557_v17 = vmax.f32 %v539_v60, 1e-24  ;;  %v558_v18 = vmax.f32 %v541_v62, 1e-24  ;;  %v4346_v41 = vmax.f32 %v3871_v39, 0.0 }
 0x32d   :  { %v3177_v19 = vpop.eup %3176  ;;  %v3878_v22 = vmul.f32 %v3175_v16, %v3791_v47 }
 0x32e   :  { %3186 = vrsqrt.f32 %v557_v17  ;;  %2460 = vmatmul.mubr.f32.gmra.mrb[4].mxu0 %v4347_v63  ;;  %v3883_v46 = vmul.f32 %v3177_v19, %v3798_v52  ;;  %v1460_v63 = vld [vmem:[#allocation11 + $0x10] sm:$0xff] }
 0x32f   :  { %3188 = vrsqrt.f32 %v558_v18  ;;  %2462 = vmatprep.mubr.f32.mxu0 %v4346_v41  ;;  %v543_v23 = vpop.xlane.xlu1 %542  ;;  %v4345_v27 = vmax.f32 %v3878_v22, 0.0  ;;  %v4352_v20 = vmax.f32 %v3878_v22, 0.0 }
 0x330   :  { %v3179_v30 = vpop.eup %3178  ;;  %v559_v31 = vmax.f32 %v543_v23, 1e-24  ;;  %v4344_v32 = vmax.f32 %v3883_v46, 0.0 }
 0x331   :  { %v3181_v47 = vpop.eup %3180  ;;  %v3890_v37 = vmul.f32 %v3179_v30, %v3801_v56 }
 0x332   :  { %3190 = vrsqrt.f32 %v559_v31  ;;  %2463 = vmatmul.mubr.f32.gmra.mrb[6].mxu0 %v4345_v27  ;;  %v3895_v52 = vmul.f32 %v3181_v47, %v3808_v61 }
 0x333   :  { %2465 = vmatprep.mubr.f32.mxu0 %v4344_v32  ;;  %v4343_v42 = vmax.f32 %v3890_v37, 0.0  ;;  %v4354_v36 = vmax.f32 %v3890_v37, 0.0 }
 0x334   :  { %v3183_v44 = vpop.eup %3182  ;;  %v4342_v45 = vmax.f32 %v3895_v52, 0.0  ;;  %v4355_v28 = vmax.f32 %v3895_v52, 0.0 }
 0x335   :  { %v3185_v48 = vpop.eup %3184  ;;  %v3902_v50 = vmul.f32 %v3183_v44, %v3811_v0 }
 0x336   :  { %2466 = vmatmul.mubr.f32.gmra.mrb[8].mxu0 %v4343_v42  ;;  %v3907_v56 = vmul.f32 %v3185_v48, %v3818_v21 }
 0x337   :  { %2468 = vmatprep.mubr.f32.mxu0 %v4342_v45  ;;  %v4341_v61 = vmax.f32 %v3902_v50, 0.0 }
 0x338   :  { %v3187_v33 = vpop.eup %3186  ;;  %v4340_v51 = vmax.f32 %v3907_v56, 0.0 }
 0x339   :  { %v3189_v54 = vpop.eup %3188  ;;  %v3914_v55 = vmul.f32 %v3187_v33, %v3821_v24 }
 0x33a   :  { %2469 = vmatmul.mubr.f32.gmra.mrb[10].mxu0 %v4341_v61  ;;  %v3919_v0 = vmul.f32 %v3189_v54, %v3828_v35 }
 0x33b   :  { %2471 = vmatprep.mubr.f32.mxu0 %v4340_v51  ;;  %v4339_v21 = vmax.f32 %v3914_v55, 0.0  ;;  %v4358_v25 = vmax.f32 %v3914_v55, 0.0 }
 0x33c   :  { %v3191_v57 = vpop.eup %3190  ;;  %v4338_v58 = vmax.f32 %v3919_v0, 0.0 }
 0x33d   :  { %v3926_v60 = vmul.f32 %v3191_v57, %v3831_v38 }
 0x33e   :  { %2472 = vmatmul.mubr.f32.gmra.mrb[12].mxu0 %v4339_v21 }
 0x33f   :  { %2474 = vmatprep.mubr.f32.mxu0 %v4338_v58  ;;  %v4337_v24 = vmax.f32 %v3926_v60, 0.0 }
 0x342   :  { %2475 = vmatmul.mubr.f32.gmra.mrb[14].mxu0 %v4337_v24 }
 0x3f9   :  { %v2455_v35 = vpop.f32.mrb[0].mxu0 }
 0x3fa   :  { %v690_v62 = vpop.f32.mrb[1].mxu0 }
 0x3fb   :  { %v2909_v16 = vpack.c.bf16 %v2455_v35, %v690_v62 }
 0x3fd   :  { %v2458_v17 = vpop.f32.mrb[2].mxu0  ;;  %2910 = vmatprep.subr.bf16.mxu1 %v2909_v16 }
 0x3fe   :  { %v700_v18 = vpop.f32.mrb[3].mxu0  ;;  %2912 = vmatpush3.bf16.msra.mxu1 %v2909_v16 }
 0x3ff   :  { %v2913_v38 = vpack.c.bf16 %v2458_v17, %v700_v18 }
 0x401   :  { %v2461_v19 = vpop.f32.mrb[4].mxu0  ;;  %2914 = vmatprep.subr.bf16.mxu1 %v2913_v38 }
 0x402   :  { %v710_v23 = vpop.f32.mrb[5].mxu0  ;;  %2916 = vmatpush3.bf16.msra.mxu1 %v2913_v38 }
 0x403   :  { %v2917_v30 = vpack.c.bf16 %v2461_v19, %v710_v23 }
 0x405   :  { %v2464_v31 = vpop.f32.mrb[6].mxu0  ;;  %2918 = vmatprep.subr.bf16.mxu1 %v2917_v30 }
 0x406   :  { %v720_v47 = vpop.f32.mrb[7].mxu0  ;;  %2920 = vmatpush3.bf16.msra.mxu1 %v2917_v30 }
 0x407   :  { %v2921_v44 = vpack.c.bf16 %v2464_v31, %v720_v47 }
 0x409   :  { %v2467_v48 = vpop.f32.mrb[8].mxu0  ;;  %2922 = vmatprep.subr.bf16.mxu1 %v2921_v44 }
 0x40a   :  { %v730_v33 = vpop.f32.mrb[9].mxu0  ;;  %2924 = vmatpush3.bf16.msra.mxu1 %v2921_v44 }
 0x40b   :  { %v2925_v54 = vpack.c.bf16 %v2467_v48, %v730_v33 }
 0x40d   :  { %v2470_v57 = vpop.f32.mrb[10].mxu0  ;;  %2926 = vmatprep.subr.bf16.mxu1 %v2925_v54 }
 0x40e   :  { %v740_v35 = vpop.f32.mrb[11].mxu0  ;;  %2928 = vmatpush3.bf16.msra.mxu1 %v2925_v54 }
 0x40f   :  { %v2929_v62 = vpack.c.bf16 %v2470_v57, %v740_v35 }
 0x411   :  { %v2473_v16 = vpop.f32.mrb[12].mxu0  ;;  %2930 = vmatprep.subr.bf16.mxu1 %v2929_v62 }
 0x412   :  { %v750_v17 = vpop.f32.mrb[13].mxu0  ;;  %2932 = vmatpush3.bf16.msra.mxu1 %v2929_v62 }
 0x413   :  { %v2933_v18 = vpack.c.bf16 %v2473_v16, %v750_v17 }
 0x415   :  { %v2476_v38 = vpop.f32.mrb[14].mxu0  ;;  %2934 = vmatprep.subr.bf16.mxu1 %v2933_v18 }
 0x416   :  { %v760_v19 = vpop.f32.mrb[15].mxu0  ;;  %2936 = vmatpush3.bf16.msra.mxu1 %v2933_v18 }
 0x417   :  { %v2937_v23 = vpack.c.bf16 %v2476_v38, %v760_v19 }
 0x419   :  { %2938 = vmatprep.subr.bf16.mxu1 %v2937_v23 }
 0x41a   :  { %2940 = vmatpush3.bf16.msra.mxu1 %v2937_v23 }
 0x41d   :  { %2510 = vmatmul.mubr.f32.vlgmr.msra.gmra.mrb[32].mxu1 %v3708_v1  ;;  %v1033_v1 = vld [vmem:[#allocation10] sm:$0xff] }
 0x41e   :  { %2512 = vmatprep.mubr.f32.mxu1 %v3710_v2  ;;  %v1034_v2 = vld [vmem:[#allocation10 + $0x8] sm:$0xff] }
 0x421   :  { %2513 = vmatmul.mubr.f32.gmra.mrb[34].mxu1 %v3714_v3  ;;  %v1035_v3 = vld [vmem:[#allocation10 + $0x10] sm:$0xff] }
 0x422   :  { %2515 = vmatprep.mubr.f32.mxu1 %v3716_v4  ;;  %v2941_v4 = vpack.c.bf16 %v1034_v2, %v1033_v1 }
 0x424   :  { %2942 = vmatprep.subr.bf16.mxu0 %v2941_v4 }
 0x425   :  { %2516 = vmatmul.mubr.f32.gmra.mrb[36].mxu1 %v3720_v5  ;;  %v1036_v5 = vld [vmem:[#allocation10 + $0x18] sm:$0xff]  ;;  %2944 = vmatpush3.bf16.msra.mxu0 %v2941_v4 }
 0x426   :  { %2518 = vmatprep.mubr.f32.mxu1 %v3722_v6  ;;  %v2945_v6 = vpack.c.bf16 %v1036_v5, %v1035_v3 }
 0x428   :  { %2946 = vmatprep.subr.bf16.mxu0 %v2945_v6 }
 0x429   :  { %2519 = vmatmul.mubr.f32.gmra.mrb[38].mxu1 %v3726_v7  ;;  %v1037_v7 = vld [vmem:[#allocation10 + $0x20] sm:$0xff]  ;;  %2948 = vmatpush3.bf16.msra.mxu0 %v2945_v6 }
 0x42a   :  { %2521 = vmatprep.mubr.f32.mxu1 %v3728_v8  ;;  %v1038_v8 = vld [vmem:[#allocation10 + $0x28] sm:$0xff] }
 0x42d   :  { %2522 = vmatmul.mubr.f32.gmra.mrb[40].mxu1 %v3732_v9  ;;  %v2949_v9 = vpack.c.bf16 %v1038_v8, %v1037_v7 }
 0x42e   :  { %2524 = vmatprep.mubr.f32.mxu1 %v3734_v10  ;;  %v1039_v10 = vld [vmem:[#allocation10 + $0x30] sm:$0xff] }
 0x42f   :  { %2950 = vmatprep.subr.bf16.mxu0 %v2949_v9 }
 0x430   :  { %2952 = vmatpush3.bf16.msra.mxu0 %v2949_v9 }
 0x431   :  { %2525 = vmatmul.mubr.f32.gmra.mrb[42].mxu1 %v3738_v11  ;;  %v1040_v11 = vld [vmem:[#allocation10 + $0x38] sm:$0xff] }
 0x432   :  { %2527 = vmatprep.mubr.f32.mxu1 %v3740_v12  ;;  %v2953_v12 = vpack.c.bf16 %v1040_v11, %v1039_v10  ;;  %v1041_v11 = vld [vmem:[#allocation10 + $0x40] sm:$0xff] }
 0x434   :  { %2954 = vmatprep.subr.bf16.mxu0 %v2953_v12 }
 0x435   :  { %2528 = vmatmul.mubr.f32.gmra.mrb[44].mxu1 %v3744_v13  ;;  %2956 = vmatpush3.bf16.msra.mxu0 %v2953_v12  ;;  %v1042_v12 = vld [vmem:[#allocation10 + $0x48] sm:$0xff] }
 0x436   :  { %2530 = vmatprep.mubr.f32.mxu1 %v3746_v14 }
 0x439   :  { %2531 = vmatmul.mubr.f32.gmra.mrb[46].mxu1 %v3750_v15 }
 0x43a   :  { %2621 = vmatprep.mubr.f32.mxu1 %v3705_v40  ;;  %v3954_v40 = vld [vmem:[%s4329_s5] ss:$0 sm:$0xff] }
 0x4f0   :  { %v2511_v13 = vpop.f32.mrb[32].mxu1 }
 0x4f1   :  { %v3957_v14 = vadd.f32 %v2511_v13, %v3954_v40  ;;  %v842_v15 = vpop.f32.mrb[33].mxu1 }
 0x4f2   :  { %v3960_v30 = vadd.f32 %v3954_v40, %v842_v15 }
 0x4f3   :  { %v922_v31 = vmul.f32 %v3957_v14, %v3957_v14 }
 0x4f4   :  { %v2514_v47 = vpop.f32.mrb[34].mxu1  ;;  %v921_v44 = vmul.f32 %v3960_v30, %v3960_v30 }
 0x4f5   :  { %v3967_v48 = vadd.f32 %v2514_v47, %v3954_v40  ;;  %939 = vadd.xlane.f32.xlu1 %v922_v31  ;;  %v852_v33 = vpop.f32.mrb[35].mxu1  ;;  %v2957_v31 = vpack.c.bf16 %v1042_v12, %v1041_v11 }
 0x4f6   :  { %v3970_v54 = vadd.f32 %v3954_v40, %v852_v33  ;;  %937 = vadd.xlane.f32.xlu0 %v921_v44 }
 0x4f7   :  { %v924_v57 = vmul.f32 %v3967_v48, %v3967_v48  ;;  %2958 = vmatprep.subr.bf16.mxu0 %v2957_v31 }
 0x4f8   :  { %v2517_v35 = vpop.f32.mrb[36].mxu1  ;;  %v923_v62 = vmul.f32 %v3970_v54, %v3970_v54  ;;  %2960 = vmatpush3.bf16.msra.mxu0 %v2957_v31 }
 0x4f9   :  { %v3977_v16 = vadd.f32 %v2517_v35, %v3954_v40  ;;  %943 = vadd.xlane.f32.xlu1 %v924_v57  ;;  %v862_v17 = vpop.f32.mrb[37].mxu1  ;;  %v1043_v35 = vld [vmem:[#allocation10 + $0x50] sm:$0xff] }
 0x4fa   :  { %v3980_v18 = vadd.f32 %v3954_v40, %v862_v17  ;;  %941 = vadd.xlane.f32.xlu0 %v923_v62  ;;  %v1044_v62 = vld [vmem:[#allocation10 + $0x58] sm:$0xff] }
 0x4fb   :  { %v926_v38 = vmul.f32 %v3977_v16, %v3977_v16 }
 0x4fc   :  { %v2520_v19 = vpop.f32.mrb[38].mxu1  ;;  %v925_v23 = vmul.f32 %v3980_v18, %v3980_v18 }
 0x4fd   :  { %v3987_v1 = vadd.f32 %v2520_v19, %v3954_v40  ;;  %947 = vadd.xlane.f32.xlu1 %v926_v38  ;;  %v872_v2 = vpop.f32.mrb[39].mxu1  ;;  %v2961_v19 = vpack.c.bf16 %v1044_v62, %v1043_v35  ;;  %v1048_v35 = vld [vmem:[#allocation10 + $0x78] sm:$0xff] }
 0x4fe   :  { %v3990_v3 = vadd.f32 %v3954_v40, %v872_v2  ;;  %945 = vadd.xlane.f32.xlu0 %v925_v23 }
 0x4ff   :  { %v928_v4 = vmul.f32 %v3987_v1, %v3987_v1  ;;  %2962 = vmatprep.subr.bf16.mxu0 %v2961_v19 }
 0x500   :  { %v2523_v5 = vpop.f32.mrb[40].mxu1  ;;  %v927_v6 = vmul.f32 %v3990_v3, %v3990_v3  ;;  %2964 = vmatpush3.bf16.msra.mxu0 %v2961_v19  ;;  %v1475_v19 = vld [vmem:[#allocation13 + $0x8] sm:$0xff] }
 0x501   :  { %v3997_v7 = vadd.f32 %v2523_v5, %v3954_v40  ;;  %951 = vadd.xlane.f32.xlu1 %v928_v4  ;;  %v882_v8 = vpop.f32.mrb[41].mxu1 }
 0x502   :  { %v4000_v9 = vadd.f32 %v3954_v40, %v882_v8  ;;  %949 = vadd.xlane.f32.xlu0 %v927_v6  ;;  %v1045_v6 = vld [vmem:[#allocation10 + $0x60] sm:$0xff]  ;;  %v1046_v8 = vld [vmem:[#allocation10 + $0x68] sm:$0xff] }
 0x503   :  { %v930_v10 = vmul.f32 %v3997_v7, %v3997_v7  ;;  %v2965_v12 = vpack.c.bf16 %v1046_v8, %v1045_v6 }
 0x504   :  { %v2526_v13 = vpop.f32.mrb[42].mxu1  ;;  %v929_v15 = vmul.f32 %v4000_v9, %v4000_v9 }
 0x505   :  { %v4007_v47 = vadd.f32 %v2526_v13, %v3954_v40  ;;  %955 = vadd.xlane.f32.xlu1 %v930_v10  ;;  %v892_v44 = vpop.f32.mrb[43].mxu1  ;;  %2966 = vmatprep.subr.bf16.mxu0 %v2965_v12 }
 0x506   :  { %v4010_v33 = vadd.f32 %v3954_v40, %v892_v44  ;;  %953 = vadd.xlane.f32.xlu0 %v929_v15  ;;  %2968 = vmatpush3.bf16.msra.mxu0 %v2965_v12 }
 0x507   :  { %v932_v57 = vmul.f32 %v4007_v47, %v4007_v47 }
 0x508   :  { %v2529_v17 = vpop.f32.mrb[44].mxu1  ;;  %v931_v38 = vmul.f32 %v4010_v33, %v4010_v33 }
 0x509   :  { %v4017_v23 = vadd.f32 %v2529_v17, %v3954_v40  ;;  %959 = vadd.xlane.f32.xlu1 %v932_v57  ;;  %v902_v2 = vpop.f32.mrb[45].mxu1  ;;  %v1047_v57 = vld [vmem:[#allocation10 + $0x70] sm:$0xff] }
 0x50a   :  { %v4020_v4 = vadd.f32 %v3954_v40, %v902_v2  ;;  %957 = vadd.xlane.f32.xlu0 %v931_v38  ;;  %v2969_v17 = vpack.c.bf16 %v1048_v35, %v1047_v57  ;;  %v1474_v38 = vld [vmem:[#allocation13] sm:$0xff] }
 0x50b   :  { %v934_v5 = vmul.f32 %v4017_v23, %v4017_v23 }
 0x50c   :  { %v2532_v10 = vpop.f32.mrb[46].mxu1  ;;  %v933_v11 = vmul.f32 %v4020_v4, %v4020_v4  ;;  %2970 = vmatprep.subr.bf16.mxu0 %v2969_v17 }
 0x50d   :  { %v4027_v13 = vadd.f32 %v2532_v10, %v3954_v40  ;;  %963 = vadd.xlane.f32.xlu1 %v934_v5  ;;  %v912_v15 = vpop.f32.mrb[47].mxu1  ;;  %2972 = vmatpush3.bf16.msra.mxu0 %v2969_v17 }
 0x50e   :  { %v4030_v31 = vadd.f32 %v3954_v40, %v912_v15  ;;  %961 = vadd.xlane.f32.xlu0 %v933_v11  ;;  %v3005_v40 = vpack.c.bf16 %v1475_v19, %v1474_v38 }
 0x50f   :  { %v936_v44 = vmul.f32 %v4027_v13, %v4027_v13 }
 0x510   :  { %v935_v62 = vmul.f32 %v4030_v31, %v4030_v31  ;;  %3006 = vmatprep.subr.bf16.mxu0 %v3005_v40 }
 0x511   :  { %967 = vadd.xlane.f32.xlu1 %v936_v44 }
 0x512   :  { %965 = vadd.xlane.f32.xlu0 %v935_v62 }
 0x582   :  { %v940_v2 = vpop.xlane.xlu1 %939 }
 0x583   :  { %v970_v5 = vmax.f32 %v940_v2, 1e-24  ;;  %v938_v6 = vpop.xlane.xlu0 %937 }
 0x584   :  { %v969_v8 = vmax.f32 %v938_v6, 1e-24 }
 0x585   :  { %3192 = vrsqrt.f32 %v970_v5 }
 0x586   :  { %3194 = vrsqrt.f32 %v969_v8  ;;  %v944_v10 = vpop.xlane.xlu1 %943 }
 0x587   :  { %v972_v11 = vmax.f32 %v944_v10, 1e-24  ;;  %v942_v12 = vpop.xlane.xlu0 %941  ;;  %v1476_v10 = vld [vmem:[#allocation13 + $0x10] sm:$0xff] }
 0x588   :  { %v971_v15 = vmax.f32 %v942_v12, 1e-24 }
 0x589   :  { %3196 = vrsqrt.f32 %v972_v11  ;;  %v1477_v11 = vld [vmem:[#allocation13 + $0x18] sm:$0xff] }
 0x58a   :  { %3198 = vrsqrt.f32 %v971_v15  ;;  %v948_v44 = vpop.xlane.xlu1 %947 }
 0x58b   :  { %v974_v57 = vmax.f32 %v948_v44, 1e-24  ;;  %v946_v35 = vpop.xlane.xlu0 %945 }
 0x58c   :  { %v973_v62 = vmax.f32 %v946_v35, 1e-24 }
 0x58d   :  { %3200 = vrsqrt.f32 %v974_v57 }
 0x58e   :  { %3202 = vrsqrt.f32 %v973_v62  ;;  %v952_v17 = vpop.xlane.xlu1 %951 }
 0x58f   :  { %v3193_v38 = vpop.eup %3192  ;;  %v976_v19 = vmax.f32 %v952_v17, 1e-24  ;;  %v950_v2 = vpop.xlane.xlu0 %949 }
 0x590   :  { %v3195_v24 = vpop.eup %3194  ;;  %v4037_v5 = vmul.f32 %v3193_v38, %v3957_v14  ;;  %v975_v6 = vmax.f32 %v950_v2, 1e-24  ;;  %v3009_v38 = vpack.c.bf16 %v1477_v11, %v1476_v10 }
 0x591   :  { %3204 = vrsqrt.f32 %v976_v19  ;;  %v4040_v8 = vmul.f32 %v3195_v24, %v3960_v30  ;;  %v1478_v30 = vld [vmem:[#allocation13 + $0x20] sm:$0xff]  ;;  %v1479_v19 = vld [vmem:[#allocation13 + $0x28] sm:$0xff] }
 0x592   :  { %3206 = vrsqrt.f32 %v975_v6  ;;  %v956_v12 = vpop.xlane.xlu1 %955  ;;  %v1018_v58 = vmax.f32 %v4037_v5, 0.0  ;;  %v1467_v5 = vld [vmem:[#allocation11 + $0x48] sm:$0xff] }
 0x593   :  { %v3197_v15 = vpop.eup %3196  ;;  %v978_v44 = vmax.f32 %v956_v12, 1e-24  ;;  %v954_v57 = vpop.xlane.xlu0 %953  ;;  %v1017_v35 = vmax.f32 %v4040_v8, 0.0  ;;  %v1469_v8 = vld [vmem:[#allocation11 + $0x58] sm:$0xff] }
 0x594   :  { %v3199_v62 = vpop.eup %3198  ;;  %v977_v17 = vmax.f32 %v954_v57, 1e-24  ;;  %v4045_v14 = vmul.f32 %v3197_v15, %v3967_v48  ;;  %v3013_v57 = vpack.c.bf16 %v1479_v19, %v1478_v30 }
 0x595   :  { %3208 = vrsqrt.f32 %v978_v44  ;;  %2565 = vmatprep.mubr.f32.mxu0 %v1017_v35  ;;  %v4050_v24 = vmul.f32 %v3199_v62, %v3970_v54 }
 0x596   :  { %3210 = vrsqrt.f32 %v977_v17  ;;  %v960_v2 = vpop.xlane.xlu1 %959  ;;  %2566 = vmatmul.mubr.f32.vlgmr.msra.gmra.mrb[16].mxu0 %v1018_v58  ;;  %v1020_v44 = vmax.f32 %v4045_v14, 0.0  ;;  %v1481_v17 = vld [vmem:[#allocation13 + $0x38] sm:$0xff]  ;;  %v1470_v14 = vld [vmem:[#allocation11 + $0x60] sm:$0xff] }
 0x597   :  { %v3201_v6 = vpop.eup %3200  ;;  %v980_v12 = vmax.f32 %v960_v2, 1e-24  ;;  %3008 = vmatpush3.bf16.msra.mxu0 %v3005_v40  ;;  %v958_v48 = vpop.xlane.xlu0 %957  ;;  %v1019_v10 = vmax.f32 %v4050_v24, 0.0  ;;  %v1480_v40 = vld [vmem:[#allocation13 + $0x30] sm:$0xff]  ;;  %v1471_v24 = vld [vmem:[#allocation11 + $0x68] sm:$0xff] }
 0x598   :  { %v3203_v11 = vpop.eup %3202  ;;  %v979_v15 = vmax.f32 %v958_v48, 1e-24  ;;  %3010 = vmatprep.subr.bf16.mxu0 %v3009_v38  ;;  %v4057_v54 = vmul.f32 %v3201_v6, %v3977_v16 }
 0x599   :  { %3212 = vrsqrt.f32 %v980_v12  ;;  %2568 = vmatprep.mubr.f32.mxu0 %v1019_v10  ;;  %v4062_v62 = vmul.f32 %v3203_v11, %v3980_v18  ;;  %v3017_v11 = vpack.c.bf16 %v1481_v17, %v1480_v40 }
 0x59a   :  { %3214 = vrsqrt.f32 %v979_v15  ;;  %v964_v2 = vpop.xlane.xlu1 %963  ;;  %2569 = vmatmul.mubr.f32.gmra.mrb[18].mxu0 %v1020_v44  ;;  %v1022_v12 = vmax.f32 %v4057_v54, 0.0  ;;  %v1473_v54 = vld [vmem:[#allocation11 + $0x78] sm:$0xff] }
 0x59b   :  { %v3205_v48 = vpop.eup %3204  ;;  %v982_v21 = vmax.f32 %v964_v2, 1e-24  ;;  %3012 = vmatpush3.bf16.msra.mxu0 %v3009_v38  ;;  %v962_v16 = vpop.xlane.xlu0 %961  ;;  %v1021_v30 = vmax.f32 %v4062_v62, 0.0  ;;  %v1482_v38 = vld [vmem:[#allocation13 + $0x40] sm:$0xff]  ;;  %v1483_v2 = vld [vmem:[#allocation13 + $0x48] sm:$0xff]  ;;  %v4350_v62 = vmax.f32 %v3866_v59, 0.0 }
 0x59c   :  { %v3207_v19 = vpop.eup %3206  ;;  %v981_v6 = vmax.f32 %v962_v16, 1e-24  ;;  %3014 = vmatprep.subr.bf16.mxu0 %v3013_v57  ;;  %v4069_v18 = vmul.f32 %v3205_v48, %v3987_v1 }
 0x59d   :  { %3216 = vrsqrt.f32 %v982_v21  ;;  %2571 = vmatprep.mubr.f32.mxu0 %v1021_v30  ;;  %v4074_v15 = vmul.f32 %v3207_v19, %v3990_v3  ;;  %v3021_v19 = vpack.c.bf16 %v1483_v2, %v1482_v38 }
 0x59e   :  { %3218 = vrsqrt.f32 %v981_v6  ;;  %v968_v51 = vpop.xlane.xlu1 %967  ;;  %2572 = vmatmul.mubr.f32.gmra.mrb[20].mxu0 %v1022_v12  ;;  %v1024_v48 = vmax.f32 %v4069_v18, 0.0 }
 0x59f   :  { %v3209_v16 = vpop.eup %3208  ;;  %v984_v61 = vmax.f32 %v968_v51, 1e-24  ;;  %3016 = vmatpush3.bf16.msra.mxu0 %v3013_v57  ;;  %v966_v1 = vpop.xlane.xlu0 %965  ;;  %v1023_v40 = vmax.f32 %v4074_v15, 0.0  ;;  %v1484_v51 = vld [vmem:[#allocation13 + $0x50] sm:$0xff]  ;;  %v1485_v57 = vld [vmem:[#allocation13 + $0x58] sm:$0xff] }
 0x5a0   :  { %v3211_v21 = vpop.eup %3210  ;;  %v983_v17 = vmax.f32 %v966_v1, 1e-24  ;;  %3018 = vmatprep.subr.bf16.mxu0 %v3017_v11  ;;  %v4081_v3 = vmul.f32 %v3209_v16, %v3997_v7  ;;  %v3025_v2 = vpack.c.bf16 %v1485_v57, %v1484_v51  ;;  %v1486_v16 = vld [vmem:[#allocation13 + $0x60] sm:$0xff] }
 0x5a1   :  { %3220 = vrsqrt.f32 %v984_v61  ;;  %2574 = vmatprep.mubr.f32.mxu0 %v1023_v40  ;;  %v4086_v6 = vmul.f32 %v3211_v21, %v4000_v9  ;;  %v1487_v21 = vld [vmem:[#allocation13 + $0x68] sm:$0xff] }
 0x5a2   :  { %3222 = vrsqrt.f32 %v983_v17  ;;  %2575 = vmatmul.mubr.f32.gmra.mrb[22].mxu0 %v1024_v48  ;;  %v1026_v38 = vmax.f32 %v4081_v3, 0.0  ;;  %v3029_v57 = vpack.c.bf16 %v1487_v21, %v1486_v16 }
 0x5a3   :  { %v3213_v1 = vpop.eup %3212  ;;  %3020 = vmatpush3.bf16.msra.mxu0 %v3017_v11  ;;  %v1025_v45 = vmax.f32 %v4086_v6, 0.0 }
 0x5a4   :  { %v3215_v7 = vpop.eup %3214  ;;  %3022 = vmatprep.subr.bf16.mxu0 %v3021_v19  ;;  %v4093_v61 = vmul.f32 %v3213_v1, %v4007_v47  ;;  %v1488_v1 = vld [vmem:[#allocation13 + $0x70] sm:$0xff] }
 0x5a5   :  { %2577 = vmatprep.mubr.f32.mxu0 %v1025_v45  ;;  %v4098_v9 = vmul.f32 %v3215_v7, %v4010_v33  ;;  %v1489_v7 = vld [vmem:[#allocation13 + $0x78] sm:$0xff] }
 0x5a6   :  { %2578 = vmatmul.mubr.f32.gmra.mrb[24].mxu0 %v1026_v38  ;;  %v1028_v47 = vmax.f32 %v4093_v61, 0.0  ;;  %v3033_v21 = vpack.c.bf16 %v1489_v7, %v1488_v1  ;;  %v1464_v1 = vld [vmem:[#allocation11 + $0x30] sm:$0xff]  ;;  %v1465_v7 = vld [vmem:[#allocation11 + $0x38] sm:$0xff] }
 0x5a7   :  { %v3217_v11 = vpop.eup %3216  ;;  %3024 = vmatpush3.bf16.msra.mxu0 %v3021_v19  ;;  %v1027_v17 = vmax.f32 %v4098_v9, 0.0 }
 0x5a8   :  { %v3219_v42 = vpop.eup %3218  ;;  %3026 = vmatprep.subr.bf16.mxu0 %v3025_v2  ;;  %v4105_v51 = vmul.f32 %v3217_v11, %v4017_v23  ;;  %v1459_v11 = vld [vmem:[#allocation11 + $0x8] sm:$0xff] }
 0x5a9   :  { %2580 = vmatprep.mubr.f32.mxu0 %v1027_v17  ;;  %v4110_v33 = vmul.f32 %v3219_v42, %v4020_v4  ;;  %v1458_v4 = vld [vmem:[#allocation11] sm:$0xff] }
 0x5aa   :  { %2581 = vmatmul.mubr.f32.gmra.mrb[26].mxu0 %v1028_v47  ;;  %v1030_v23 = vmax.f32 %v4105_v51, 0.0  ;;  %v3037_v41 = vpack.c.bf16 %v1459_v11, %v1458_v4  ;;  %v3261_v4 = vld [vmem:[#allocation2 + $0x30] sm:$0xff]  ;;  %v3262_v11 = vld [vmem:[#allocation2 + $0x38] sm:$0xff] }
 0x5ab   :  { %v3221_v19 = vpop.eup %3220  ;;  %3028 = vmatpush3.bf16.msra.mxu0 %v3025_v2  ;;  %v1029_v32 = vmax.f32 %v4110_v33, 0.0 }
 0x5ac   :  { %v3223_v27 = vpop.eup %3222  ;;  %3030 = vmatprep.subr.bf16.mxu0 %v3029_v57  ;;  %v4117_v16 = vmul.f32 %v3221_v19, %v4027_v13  ;;  %v1462_v13 = vld [vmem:[#allocation11 + $0x20] sm:$0xff]  ;;  %v3256_v19 = vld [vmem:[#allocation2 + $0x8] sm:$0xff] }
 0x5ad   :  { %2583 = vmatprep.mubr.f32.mxu0 %v1029_v32  ;;  %v1015_v42 = vmul.f32 %v3223_v27, %v4030_v31  ;;  %v3041_v27 = vpack.c.bf16 %v1461_v34, %v1460_v63  ;;  %v1463_v31 = vld [vmem:[#allocation11 + $0x28] sm:$0xff]  ;;  %v3049_v34 = vpack.c.bf16 %v1465_v7, %v1464_v1  ;;  %v1466_v63 = vld [vmem:[#allocation11 + $0x40] sm:$0xff]  ;;  %v3269_v1 = vld [vmem:[#allocation2 + $0x70] sm:$0xff] }
 0x5ae   :  { %2584 = vmatmul.mubr.f32.gmra.mrb[28].mxu0 %v1030_v23  ;;  %v1032_v33 = vmax.f32 %v4117_v16, 0.0  ;;  %v3258_v16 = vld [vmem:[#allocation2 + $0x18] sm:$0xff] }
 0x5af   :  { %3032 = vmatpush3.bf16.msra.mxu0 %v3029_v57  ;;  %v1031_v2 = vmax.f32 %v1015_v42, 0.0  ;;  %v3045_v57 = vpack.c.bf16 %v1463_v31, %v1462_v13  ;;  %v3260_v42 = vld [vmem:[#allocation2 + $0x28] sm:$0xff]  ;;  %v3266_v13 = vld [vmem:[#allocation2 + $0x58] sm:$0xff]  ;;  %v3267_v31 = vld [vmem:[#allocation2 + $0x60] sm:$0xff] }
 0x5b0   :  { %3034 = vmatprep.subr.bf16.mxu0 %v3033_v21  ;;  %v3270_v7 = vld [vmem:[#allocation2 + $0x78] sm:$0xff] }
 0x5b1   :  { %2586 = vmatprep.mubr.f32.mxu0 %v1031_v2 }
 0x5b2   :  { %2587 = vmatmul.mubr.f32.gmra.mrb[30].mxu0 %v1032_v33 }
 0x5b3   :  { %3036 = vmatpush3.bf16.msra.mxu0 %v3033_v21  ;;  %2677 = vmatprep.mubr.f32.mxu0 %v1017_v35  ;;  %v3259_v21 = vld [vmem:[#allocation2 + $0x20] sm:$0xff] }
 0x5b4   :  { %3038 = vmatprep.subr.bf16.mxu0 %v3037_v41 }
 0x5b6   :  { %2678 = vmatmul.mubr.f32.vlgmr.msra.gmra.mrb[32].mxu0 %v1018_v58  ;;  %v1468_v58 = vld [vmem:[#allocation11 + $0x50] sm:$0xff] }
 0x5b7   :  { %2680 = vmatprep.mubr.f32.mxu0 %v1019_v10  ;;  %3040 = vmatpush3.bf16.msra.mxu0 %v3037_v41  ;;  %v3053_v41 = vpack.c.bf16 %v1467_v5, %v1466_v63  ;;  %v3057_v35 = vpack.c.bf16 %v1469_v8, %v1468_v58  ;;  %v3061_v10 = vpack.c.bf16 %v1471_v24, %v1470_v14  ;;  %v1780_v24 = vld [vmem:[#allocation14] sm:$0xff] }
 0x5b8   :  { %3042 = vmatprep.subr.bf16.mxu0 %v3041_v27 }
 0x5ba   :  { %2681 = vmatmul.mubr.f32.gmra.mrb[34].mxu0 %v1020_v44  ;;  %v1472_v44 = vld [vmem:[#allocation11 + $0x70] sm:$0xff] }
 0x5bb   :  { %2683 = vmatprep.mubr.f32.mxu0 %v1021_v30  ;;  %3044 = vmatpush3.bf16.msra.mxu0 %v3041_v27  ;;  %v4351_v30 = vmax.f32 %v3871_v39, 0.0  ;;  %v3265_v27 = vld [vmem:[#allocation2 + $0x50] sm:$0xff] }
 0x5bc   :  { %3046 = vmatprep.subr.bf16.mxu0 %v3045_v57 }
 0x5be   :  { %2684 = vmatmul.mubr.f32.gmra.mrb[36].mxu0 %v1022_v12 }
 0x5bf   :  { %2686 = vmatprep.mubr.f32.mxu0 %v1023_v40  ;;  %3048 = vmatpush3.bf16.msra.mxu0 %v3045_v57  ;;  %v3268_v57 = vld [vmem:[#allocation2 + $0x68] sm:$0xff] }
 0x5c0   :  { %3050 = vmatprep.subr.bf16.mxu0 %v3049_v34 }
 0x5c2   :  { %2687 = vmatmul.mubr.f32.gmra.mrb[38].mxu0 %v1024_v48 }
 0x5c3   :  { %2689 = vmatprep.mubr.f32.mxu0 %v1025_v45  ;;  %3052 = vmatpush3.bf16.msra.mxu0 %v3049_v34  ;;  %v3065_v45 = vpack.c.bf16 %v1473_v54, %v1472_v44  ;;  %v1782_v44 = vld [vmem:[#allocation14 + $0x10] sm:$0xff] }
 0x5c4   :  { %3054 = vmatprep.subr.bf16.mxu0 %v3053_v41 }
 0x5c6   :  { %2690 = vmatmul.mubr.f32.gmra.mrb[40].mxu0 %v1026_v38 }
 0x5c7   :  { %2692 = vmatprep.mubr.f32.mxu0 %v1027_v17  ;;  %3056 = vmatpush3.bf16.msra.mxu0 %v3053_v41 }
 0x5c8   :  { %3058 = vmatprep.subr.bf16.mxu0 %v3057_v35 }
 0x5ca   :  { %2693 = vmatmul.mubr.f32.gmra.mrb[42].mxu0 %v1028_v47 }
 0x5cb   :  { %2695 = vmatprep.mubr.f32.mxu0 %v1029_v32  ;;  %3060 = vmatpush3.bf16.msra.mxu0 %v3057_v35  ;;  %v4349_v32 = vmax.f32 %v3859_v29, 0.0  ;;  %v4359_v29 = vmax.f32 %v3919_v0, 0.0 }
 0x5cc   :  { %3062 = vmatprep.subr.bf16.mxu0 %v3061_v10 }
 0x5ce   :  { %2696 = vmatmul.mubr.f32.gmra.mrb[44].mxu0 %v1030_v23  ;;  %v3257_v23 = vld [vmem:[#allocation2 + $0x10] sm:$0xff] }
 0x5cf   :  { %2698 = vmatprep.mubr.f32.mxu0 %v1031_v2  ;;  %3064 = vmatpush3.bf16.msra.mxu0 %v3061_v10  ;;  %v3263_v2 = vld [vmem:[#allocation2 + $0x40] sm:$0xff]  ;;  %v1781_v10 = vld [vmem:[#allocation14 + $0x8] sm:$0xff] }
 0x5d0   :  { %3066 = vmatprep.subr.bf16.mxu0 %v3065_v45  ;;  %v3069_v54 = vpack.c.bf16 %v1781_v10, %v1780_v24  ;;  %v1792_v24 = vld [vmem:[#allocation14 + $0x60] sm:$0xff]  ;;  %v1793_v10 = vld [vmem:[#allocation14 + $0x68] sm:$0xff] }
 0x5d2   :  { %2699 = vmatmul.mubr.f32.gmra.mrb[46].mxu0 %v1032_v33  ;;  %v3264_v33 = vld [vmem:[#allocation2 + $0x48] sm:$0xff] }
 0x5d3   :  { %3068 = vmatpush3.bf16.msra.mxu0 %v3065_v45  ;;  %2733 = vmatprep.mubr.f32.mxu0 %v592_v26  ;;  %v4353_v26 = vmax.f32 %v3883_v46, 0.0  ;;  %v1783_v45 = vld [vmem:[#allocation14 + $0x18] sm:$0xff] }
 0x5d4   :  { %3070 = vmatprep.subr.bf16.mxu0 %v3069_v54 }
 0x5d6   :  { %2734 = vmatmul.mubr.f32.vlgmr.msra.gmra.mrb[32].mxu0 %v593_v49  ;;  %v4357_v49 = vmax.f32 %v3907_v56, 0.0 }
 0x5d7   :  { %2736 = vmatprep.mubr.f32.mxu0 %v594_v43  ;;  %v4356_v43 = vmax.f32 %v3902_v50, 0.0  ;;  %3072 = vmatpush3.bf16.msra.mxu0 %v3069_v54 }
 0x5da   :  { %2737 = vmatmul.mubr.f32.gmra.mrb[34].mxu0 %v595_v53  ;;  %v4360_v53 = vmax.f32 %v3926_v60, 0.0 }
 0x5db   :  { %2739 = vmatprep.mubr.f32.mxu0 %v4349_v32  ;;  %v3073_v32 = vpack.c.bf16 %v1783_v45, %v1782_v44  ;;  %v3093_v45 = vpack.c.bf16 %v1793_v10, %v1792_v24 }
 0x5dd   :  { %3074 = vmatprep.subr.bf16.mxu0 %v3073_v32 }
 0x5de   :  { %2740 = vmatmul.mubr.f32.gmra.mrb[36].mxu0 %v4350_v62  ;;  %v1784_v62 = vld [vmem:[#allocation14 + $0x20] sm:$0xff] }
 0x5df   :  { %2742 = vmatprep.mubr.f32.mxu0 %v4351_v30  ;;  %v1785_v30 = vld [vmem:[#allocation14 + $0x28] sm:$0xff]  ;;  %3076 = vmatpush3.bf16.msra.mxu0 %v3073_v32 }
 0x5e2   :  { %2743 = vmatmul.mubr.f32.gmra.mrb[38].mxu0 %v4352_v20  ;;  %v3077_v20 = vpack.c.bf16 %v1785_v30, %v1784_v62 }
 0x5e3   :  { %2745 = vmatprep.mubr.f32.mxu0 %v4353_v26  ;;  %v1786_v26 = vld [vmem:[#allocation14 + $0x30] sm:$0xff] }
 0x5e4   :  { %3078 = vmatprep.subr.bf16.mxu0 %v3077_v20 }
 0x5e5   :  { %3080 = vmatpush3.bf16.msra.mxu0 %v3077_v20 }
 0x5e6   :  { %2746 = vmatmul.mubr.f32.gmra.mrb[40].mxu0 %v4354_v36  ;;  %v1787_v36 = vld [vmem:[#allocation14 + $0x38] sm:$0xff] }
 0x5e7   :  { %2748 = vmatprep.mubr.f32.mxu0 %v4355_v28  ;;  %v3081_v28 = vpack.c.bf16 %v1787_v36, %v1786_v26  ;;  %v1794_v36 = vld [vmem:[#allocation14 + $0x70] sm:$0xff] }
 0x5e9   :  { %3082 = vmatprep.subr.bf16.mxu0 %v3081_v28 }
 0x5ea   :  { %2749 = vmatmul.mubr.f32.gmra.mrb[42].mxu0 %v4356_v43  ;;  %v4200_v43 = vld [vmem:[%s4331_s7] ss:$0 sm:$0xff] }
 0x5eb   :  { %2751 = vmatprep.mubr.f32.mxu0 %v4357_v49  ;;  %3084 = vmatpush3.bf16.msra.mxu0 %v3081_v28 }
 0x5ee   :  { %2752 = vmatmul.mubr.f32.gmra.mrb[44].mxu0 %v4358_v25 }
 0x5ef   :  { %2754 = vmatprep.mubr.f32.mxu0 %v4359_v29 }
 0x5f2   :  { %2755 = vmatmul.mubr.f32.gmra.mrb[46].mxu0 %v4360_v53 }
 0x669   :  { %v2567_v59 = vpop.f32.mrb[16].mxu0 }
 0x66a   :  { %v1115_v39 = vpop.f32.mrb[17].mxu0 }
 0x66b   :  { %v2973_v22 = vpack.c.bf16 %v2567_v59, %v1115_v39 }
 0x66d   :  { %v2570_v46 = vpop.f32.mrb[18].mxu0  ;;  %2974 = vmatprep.subr.bf16.mxu1 %v2973_v22 }
 0x66e   :  { %v1125_v37 = vpop.f32.mrb[19].mxu0  ;;  %2976 = vmatpush3.bf16.msra.mxu1 %v2973_v22 }
 0x66f   :  { %v2977_v52 = vpack.c.bf16 %v2570_v46, %v1125_v37 }
 0x671   :  { %v2573_v50 = vpop.f32.mrb[20].mxu0  ;;  %2978 = vmatprep.subr.bf16.mxu1 %v2977_v52 }
 0x672   :  { %v1135_v56 = vpop.f32.mrb[21].mxu0  ;;  %2980 = vmatpush3.bf16.msra.mxu1 %v2977_v52 }
 0x673   :  { %v2981_v55 = vpack.c.bf16 %v2573_v50, %v1135_v56 }
 0x675   :  { %v2576_v12 = vpop.f32.mrb[22].mxu0  ;;  %2982 = vmatprep.subr.bf16.mxu1 %v2981_v55 }
 0x676   :  { %v1145_v0 = vpop.f32.mrb[23].mxu0  ;;  %2984 = vmatpush3.bf16.msra.mxu1 %v2981_v55 }
 0x677   :  { %v2985_v18 = vpack.c.bf16 %v2576_v12, %v1145_v0 }
 0x679   :  { %v2579_v60 = vpop.f32.mrb[24].mxu0  ;;  %2986 = vmatprep.subr.bf16.mxu1 %v2985_v18 }
 0x67a   :  { %v1155_v15 = vpop.f32.mrb[25].mxu0  ;;  %2988 = vmatpush3.bf16.msra.mxu1 %v2985_v18 }
 0x67b   :  { %v2989_v40 = vpack.c.bf16 %v2579_v60, %v1155_v15 }
 0x67d   :  { %v2582_v48 = vpop.f32.mrb[26].mxu0  ;;  %2990 = vmatprep.subr.bf16.mxu1 %v2989_v40 }
 0x67e   :  { %v1165_v3 = vpop.f32.mrb[27].mxu0  ;;  %2992 = vmatpush3.bf16.msra.mxu1 %v2989_v40 }
 0x67f   :  { %v2993_v6 = vpack.c.bf16 %v2582_v48, %v1165_v3 }
 0x681   :  { %v2585_v38 = vpop.f32.mrb[28].mxu0  ;;  %2994 = vmatprep.subr.bf16.mxu1 %v2993_v6 }
 0x682   :  { %v1175_v61 = vpop.f32.mrb[29].mxu0  ;;  %2996 = vmatpush3.bf16.msra.mxu1 %v2993_v6 }
 0x683   :  { %v2997_v9 = vpack.c.bf16 %v2585_v38, %v1175_v61 }
 0x685   :  { %v2588_v17 = vpop.f32.mrb[30].mxu0  ;;  %2998 = vmatprep.subr.bf16.mxu1 %v2997_v9 }
 0x686   :  { %v1185_v47 = vpop.f32.mrb[31].mxu0  ;;  %3000 = vmatpush3.bf16.msra.mxu1 %v2997_v9 }
 0x687   :  { %v3001_v51 = vpack.c.bf16 %v2588_v17, %v1185_v47  ;;  %v1788_v17 = vld [vmem:[#allocation14 + $0x40] sm:$0xff]  ;;  %v1789_v47 = vld [vmem:[#allocation14 + $0x48] sm:$0xff] }
 0x689   :  { %3002 = vmatprep.subr.bf16.mxu1 %v3001_v51 }
 0x68a   :  { %3004 = vmatpush3.bf16.msra.mxu1 %v3001_v51 }
 0x68b   :  { %3101 = vmatprep.subr.bf16.mxu1 %v3069_v54 }
 0x68d   :  { %2622 = vmatmul.mubr.f32.vlgmr.msra.gmra.mrb[48].mxu1 %v3256_v19 }
 0x68e   :  { %2624 = vmatprep.mubr.f32.mxu1 %v3257_v23  ;;  %3109 = vmatpush3.bf16.msra.mxu1 %v3069_v54  ;;  %v3085_v23 = vpack.c.bf16 %v1789_v47, %v1788_v17 }
 0x68f   :  { %3102 = vmatprep.subr.bf16.mxu1 %v3073_v32 }
 0x690   :  { %3086 = vmatprep.subr.bf16.mxu0 %v3085_v23 }
 0x691   :  { %2625 = vmatmul.mubr.f32.gmra.mrb[50].mxu1 %v3258_v16  ;;  %3088 = vmatpush3.bf16.msra.mxu0 %v3085_v23 }
 0x692   :  { %2627 = vmatprep.mubr.f32.mxu1 %v3259_v21  ;;  %3110 = vmatpush3.bf16.msra.mxu1 %v3073_v32 }
 0x693   :  { %3103 = vmatprep.subr.bf16.mxu1 %v3077_v20 }
 0x695   :  { %2628 = vmatmul.mubr.f32.gmra.mrb[52].mxu1 %v3260_v42 }
 0x696   :  { %2630 = vmatprep.mubr.f32.mxu1 %v3261_v4  ;;  %3111 = vmatpush3.bf16.msra.mxu1 %v3077_v20 }
 0x697   :  { %3104 = vmatprep.subr.bf16.mxu1 %v3081_v28 }
 0x699   :  { %2631 = vmatmul.mubr.f32.gmra.mrb[54].mxu1 %v3262_v11  ;;  %v1790_v11 = vld [vmem:[#allocation14 + $0x50] sm:$0xff] }
 0x69a   :  { %2633 = vmatprep.mubr.f32.mxu1 %v3263_v2  ;;  %3112 = vmatpush3.bf16.msra.mxu1 %v3081_v28  ;;  %v1791_v2 = vld [vmem:[#allocation14 + $0x58] sm:$0xff] }
 0x69b   :  { %3105 = vmatprep.subr.bf16.mxu1 %v3085_v23  ;;  %v1795_v28 = vld [vmem:[#allocation14 + $0x78] sm:$0xff] }
 0x69d   :  { %2634 = vmatmul.mubr.f32.gmra.mrb[56].mxu1 %v3264_v33 }
 0x69e   :  { %2636 = vmatprep.mubr.f32.mxu1 %v3265_v27  ;;  %3113 = vmatpush3.bf16.msra.mxu1 %v3085_v23 }
 0x6a1   :  { %2637 = vmatmul.mubr.f32.gmra.mrb[58].mxu1 %v3266_v13  ;;  %v3089_v13 = vpack.c.bf16 %v1791_v2, %v1790_v11 }
 0x6a2   :  { %2639 = vmatprep.mubr.f32.mxu1 %v3267_v31 }
 0x6a3   :  { %3090 = vmatprep.subr.bf16.mxu0 %v3089_v13  ;;  %3106 = vmatprep.subr.bf16.mxu1 %v3089_v13 }
 0x6a4   :  { %3092 = vmatpush3.bf16.msra.mxu0 %v3089_v13  ;;  %3114 = vmatpush3.bf16.msra.mxu1 %v3089_v13 }
 0x6a5   :  { %2640 = vmatmul.mubr.f32.gmra.mrb[60].mxu1 %v3268_v57  ;;  %3094 = vmatprep.subr.bf16.mxu0 %v3093_v45 }
 0x6a6   :  { %2642 = vmatprep.mubr.f32.mxu1 %v3269_v1  ;;  %3107 = vmatprep.subr.bf16.mxu1 %v3093_v45 }
 0x6a8   :  { %3096 = vmatpush3.bf16.msra.mxu0 %v3093_v45  ;;  %3115 = vmatpush3.bf16.msra.mxu1 %v3093_v45 }
 0x6a9   :  { %2643 = vmatmul.mubr.f32.gmra.mrb[62].mxu1 %v3270_v7 }
 0x6b9   :  { %v4181_v34 = vpop.f32.mrb[40].mxu0 }
 0x6ba   :  { %v4183_v63 = vpop.f32.mrb[41].mxu0 }
 0x6bd   :  { %v4185_v5 = vpop.f32.mrb[42].mxu0 }
 0x6be   :  { %v4187_v41 = vpop.f32.mrb[43].mxu0 }
 0x6c1   :  { %v4189_v58 = vpop.f32.mrb[44].mxu0 }
 0x6c2   :  { %v4191_v8 = vpop.f32.mrb[45].mxu0 }
 0x6c5   :  { %v4193_v35 = vpop.f32.mrb[46].mxu0 }
 0x6c6   :  { %v4195_v14 = vpop.f32.mrb[47].mxu0 }
 0x760   :  { %v2623_v49 = vpop.f32.mrb[48].mxu1 }
 0x761   :  { %v4203_v25 = vadd.f32 %v2623_v49, %v4200_v43  ;;  %v1267_v29 = vpop.f32.mrb[49].mxu1 }
 0x762   :  { %v4206_v53 = vadd.f32 %v4200_v43, %v1267_v29 }
 0x763   :  { %v1347_v59 = vmul.f32 %v4203_v25, %v4203_v25 }
 0x764   :  { %v2626_v39 = vpop.f32.mrb[50].mxu1  ;;  %v1346_v22 = vmul.f32 %v4206_v53, %v4206_v53 }
 0x765   :  { %v4213_v46 = vadd.f32 %v2626_v39, %v4200_v43  ;;  %1364 = vadd.xlane.f32.xlu1 %v1347_v59  ;;  %v1277_v37 = vpop.f32.mrb[51].mxu1  ;;  %v3097_v59 = vpack.c.bf16 %v1795_v28, %v1794_v36 }
 0x766   :  { %v4216_v52 = vadd.f32 %v4200_v43, %v1277_v37  ;;  %1362 = vadd.xlane.f32.xlu0 %v1346_v22 }
 0x767   :  { %v1349_v50 = vmul.f32 %v4213_v46, %v4213_v46  ;;  %3098 = vmatprep.subr.bf16.mxu0 %v3097_v59  ;;  %3108 = vmatprep.subr.bf16.mxu1 %v3097_v59 }
 0x768   :  { %v2629_v56 = vpop.f32.mrb[52].mxu1  ;;  %v1348_v55 = vmul.f32 %v4216_v52, %v4216_v52  ;;  %3100 = vmatpush3.bf16.msra.mxu0 %v3097_v59  ;;  %3116 = vmatpush3.bf16.msra.mxu1 %v3097_v59 }
 0x769   :  { %v4223_v12 = vadd.f32 %v2629_v56, %v4200_v43  ;;  %1368 = vadd.xlane.f32.xlu1 %v1349_v50  ;;  %v1287_v0 = vpop.f32.mrb[53].mxu1 }
 0x76a   :  { %v4226_v18 = vadd.f32 %v4200_v43, %v1287_v0  ;;  %1366 = vadd.xlane.f32.xlu0 %v1348_v55 }
 0x76b   :  { %v1351_v60 = vmul.f32 %v4223_v12, %v4223_v12 }
 0x76c   :  { %v2632_v15 = vpop.f32.mrb[54].mxu1  ;;  %v1350_v40 = vmul.f32 %v4226_v18, %v4226_v18 }
 0x76d   :  { %1372 = vadd.xlane.f32.xlu1 %v1351_v60  ;;  %v1297_v48 = vpop.f32.mrb[55].mxu1  ;;  %v4269_v20 = vadd.f32 %v2632_v15, %v4200_v43 }
 0x76e   :  { %1370 = vadd.xlane.f32.xlu0 %v1350_v40  ;;  %v4274_v49 = vadd.f32 %v4200_v43, %v1297_v48 }
 0x76f   :  { %v1353_v39 = vmul.f32 %v4269_v20, %v4269_v20 }
 0x770   :  { %v2635_v3 = vpop.f32.mrb[56].mxu1  ;;  %v1352_v22 = vmul.f32 %v4274_v49, %v4274_v49 }
 0x771   :  { %v4233_v6 = vadd.f32 %v2635_v3, %v4200_v43  ;;  %v1307_v38 = vpop.f32.mrb[57].mxu1 }
 0x772   :  { %v4236_v61 = vadd.f32 %v4200_v43, %v1307_v38 }
 0x773   :  { %v1355_v9 = vmul.f32 %v4233_v6, %v4233_v6 }
 0x774   :  { %v2638_v51 = vpop.f32.mrb[58].mxu1  ;;  %v1354_v19 = vmul.f32 %v4236_v61, %v4236_v61 }
 0x775   :  { %v4243_v16 = vadd.f32 %v2638_v51, %v4200_v43  ;;  %1380 = vadd.xlane.f32.xlu1 %v1355_v9  ;;  %v1317_v21 = vpop.f32.mrb[59].mxu1 }
 0x776   :  { %v4246_v42 = vadd.f32 %v4200_v43, %v1317_v21  ;;  %1378 = vadd.xlane.f32.xlu0 %v1354_v19 }
 0x777   :  { %v1357_v4 = vmul.f32 %v4243_v16, %v4243_v16 }
 0x778   :  { %v2641_v33 = vpop.f32.mrb[60].mxu1  ;;  %v1356_v27 = vmul.f32 %v4246_v42, %v4246_v42 }
 0x779   :  { %v4253_v31 = vadd.f32 %v2641_v33, %v4200_v43  ;;  %1384 = vadd.xlane.f32.xlu1 %v1357_v4  ;;  %v1327_v57 = vpop.f32.mrb[61].mxu1 }
 0x77a   :  { %v4256_v1 = vadd.f32 %v4200_v43, %v1327_v57  ;;  %1382 = vadd.xlane.f32.xlu0 %v1356_v27 }
 0x77b   :  { %v1359_v7 = vmul.f32 %v4253_v31, %v4253_v31 }
 0x77c   :  { %v2644_v44 = vpop.f32.mrb[62].mxu1  ;;  %v1358_v54 = vmul.f32 %v4256_v1, %v4256_v1 }
 0x77d   :  { %v4263_v32 = vadd.f32 %v2644_v44, %v4200_v43  ;;  %1388 = vadd.xlane.f32.xlu1 %v1359_v7  ;;  %v1337_v62 = vpop.f32.mrb[63].mxu1 }
 0x77e   :  { %v4266_v30 = vadd.f32 %v4200_v43, %v1337_v62  ;;  %1386 = vadd.xlane.f32.xlu0 %v1358_v54 }
 0x77f   :  { %v1361_v26 = vmul.f32 %v4263_v32, %v4263_v32 }
 0x780   :  { %v1360_v29 = vmul.f32 %v4266_v30, %v4266_v30 }
 0x781   :  { %1392 = vadd.xlane.f32.xlu1 %v1361_v26 }
 0x782   :  { %1390 = vadd.xlane.f32.xlu0 %v1360_v29 }
 0x785   :  { %1376 = vadd.xlane.f32.xlu1 %v1353_v39 }
 0x786   :  { %1374 = vadd.xlane.f32.xlu0 %v1352_v22 }
 0x7f2   :  { %v1365_v43 = vpop.xlane.xlu1 %1364 }
 0x7f3   :  { %v1395_v37 = vmax.f32 %v1365_v43, 1e-24  ;;  %v1363_v50 = vpop.xlane.xlu0 %1362 }
 0x7f4   :  { %v1394_v56 = vmax.f32 %v1363_v50, 1e-24 }
 0x7f5   :  { %3224 = vrsqrt.f32 %v1395_v37 }
 0x7f6   :  { %3226 = vrsqrt.f32 %v1394_v56  ;;  %v1369_v55 = vpop.xlane.xlu1 %1368 }
 0x7f7   :  { %v1397_v0 = vmax.f32 %v1369_v55, 1e-24  ;;  %v1367_v60 = vpop.xlane.xlu0 %1366 }
 0x7f8   :  { %v1396_v15 = vmax.f32 %v1367_v60, 1e-24 }
 0x7f9   :  { %3228 = vrsqrt.f32 %v1397_v0 }
 0x7fa   :  { %3230 = vrsqrt.f32 %v1396_v15  ;;  %v1373_v40 = vpop.xlane.xlu1 %1372 }
 0x7fb   :  { %v1399_v48 = vmax.f32 %v1373_v40, 1e-24  ;;  %v1371_v3 = vpop.xlane.xlu0 %1370 }
 0x7fc   :  { %v1398_v38 = vmax.f32 %v1371_v3, 1e-24 }
 0x7fd   :  { %3232 = vrsqrt.f32 %v1399_v48 }
 0x7fe   :  { %3234 = vrsqrt.f32 %v1398_v38 }
 0x7ff   :  { %v3225_v9 = vpop.eup %3224 }
 0x800   :  { %v3227_v17 = vpop.eup %3226  ;;  %v1427_v47 = vmul.f32 %v3225_v9, %v4203_v25 }
 0x801   :  { %v1426_v51 = vmul.f32 %v3227_v17, %v4206_v53 }
 0x802   :  { %v1381_v19 = vpop.xlane.xlu1 %1380  ;;  %v1443_v27 = vmax.f32 %v1427_v47, 0.0 }
 0x803   :  { %v3229_v23 = vpop.eup %3228  ;;  %v1403_v21 = vmax.f32 %v1381_v19, 1e-24  ;;  %v1379_v4 = vpop.xlane.xlu0 %1378  ;;  %v1442_v11 = vmax.f32 %v1426_v51, 0.0 }
 0x804   :  { %v3231_v2 = vpop.eup %3230  ;;  %v1402_v33 = vmax.f32 %v1379_v4, 1e-24  ;;  %v1429_v13 = vmul.f32 %v3229_v23, %v4213_v46 }
 0x805   :  { %3236 = vrsqrt.f32 %v1403_v21  ;;  %2789 = vmatprep.mubr.f32.mxu0 %v1442_v11  ;;  %v1428_v57 = vmul.f32 %v3231_v2, %v4216_v52 }
 0x806   :  { %3238 = vrsqrt.f32 %v1402_v33  ;;  %v1385_v7 = vpop.xlane.xlu1 %1384  ;;  %2790 = vmatmul.mubr.f32.vlgmr.msra.gmra.mrb[32].mxu0 %v1443_v27  ;;  %v1445_v45 = vmax.f32 %v1429_v13, 0.0 }
 0x807   :  { %v3233_v25 = vpop.eup %3232  ;;  %v1405_v24 = vmax.f32 %v1385_v7, 1e-24  ;;  %v1383_v53 = vpop.xlane.xlu0 %1382  ;;  %v1444_v10 = vmax.f32 %v1428_v57, 0.0 }
 0x808   :  { %v3235_v44 = vpop.eup %3234  ;;  %v1404_v54 = vmax.f32 %v1383_v53, 1e-24  ;;  %v1431_v62 = vmul.f32 %v3233_v25, %v4223_v12 }
 0x809   :  { %3240 = vrsqrt.f32 %v1405_v24  ;;  %2792 = vmatprep.mubr.f32.mxu0 %v1444_v10  ;;  %v1430_v46 = vmul.f32 %v3235_v44, %v4226_v18 }
 0x80a   :  { %3242 = vrsqrt.f32 %v1404_v54  ;;  %v1389_v26 = vpop.xlane.xlu1 %1388  ;;  %2793 = vmatmul.mubr.f32.gmra.mrb[34].mxu0 %v1445_v45  ;;  %v1447_v59 = vmax.f32 %v1431_v62, 0.0 }
 0x80b   :  { %v1407_v52 = vmax.f32 %v1389_v26, 1e-24  ;;  %v1387_v36 = vpop.xlane.xlu0 %1386  ;;  %v1446_v28 = vmax.f32 %v1430_v46, 0.0 }
 0x80c   :  { %v1406_v29 = vmax.f32 %v1387_v36, 1e-24 }
 0x80d   :  { %3244 = vrsqrt.f32 %v1407_v52  ;;  %2795 = vmatprep.mubr.f32.mxu0 %v1446_v28 }
 0x80e   :  { %3246 = vrsqrt.f32 %v1406_v29  ;;  %v1393_v39 = vpop.xlane.xlu1 %1392  ;;  %2796 = vmatmul.mubr.f32.gmra.mrb[36].mxu0 %v1447_v59 }
 0x80f   :  { %v3237_v22 = vpop.eup %3236  ;;  %v1409_v43 = vmax.f32 %v1393_v39, 1e-24  ;;  %v1391_v12 = vpop.xlane.xlu0 %1390 }
 0x810   :  { %v3239_v37 = vpop.eup %3238  ;;  %v1435_v50 = vmul.f32 %v3237_v22, %v4233_v6  ;;  %v1408_v18 = vmax.f32 %v1391_v12, 1e-24 }
 0x811   :  { %3248 = vrsqrt.f32 %v1409_v43  ;;  %v1434_v56 = vmul.f32 %v3239_v37, %v4236_v61 }
 0x812   :  { %3250 = vrsqrt.f32 %v1408_v18  ;;  %v1377_v55 = vpop.xlane.xlu1 %1376  ;;  %v1451_v38 = vmax.f32 %v1435_v50, 0.0 }
 0x813   :  { %v3241_v0 = vpop.eup %3240  ;;  %v1401_v60 = vmax.f32 %v1377_v55, 1e-24  ;;  %v1375_v15 = vpop.xlane.xlu0 %1374  ;;  %v1450_v40 = vmax.f32 %v1434_v56, 0.0 }
 0x814   :  { %v3243_v48 = vpop.eup %3242  ;;  %v1400_v3 = vmax.f32 %v1375_v15, 1e-24  ;;  %v1437_v9 = vmul.f32 %v3241_v0, %v4243_v16 }
 0x815   :  { %3252 = vrsqrt.f32 %v1401_v60  ;;  %2801 = vmatprep.mubr.f32.mxu1 %v1450_v40  ;;  %v1436_v17 = vmul.f32 %v3243_v48, %v4246_v42 }
 0x816   :  { %3254 = vrsqrt.f32 %v1400_v3  ;;  %2802 = vmatmul.mubr.f32.vlgmr.msra.gmra.mrb[64].mxu1 %v1451_v38  ;;  %v1453_v51 = vmax.f32 %v1437_v9, 0.0 }
 0x817   :  { %v3245_v6 = vpop.eup %3244  ;;  %v1452_v47 = vmax.f32 %v1436_v17, 0.0 }
 0x818   :  { %v3247_v61 = vpop.eup %3246  ;;  %v1439_v19 = vmul.f32 %v3245_v6, %v4253_v31 }
 0x819   :  { %2804 = vmatprep.mubr.f32.mxu1 %v1452_v47  ;;  %v1438_v23 = vmul.f32 %v3247_v61, %v4256_v1 }
 0x81a   :  { %2805 = vmatmul.mubr.f32.gmra.mrb[66].mxu1 %v1453_v51  ;;  %v1455_v16 = vmax.f32 %v1439_v19, 0.0 }
 0x81b   :  { %v3249_v21 = vpop.eup %3248  ;;  %v1454_v4 = vmax.f32 %v1438_v23, 0.0 }
 0x81c   :  { %v3251_v11 = vpop.eup %3250  ;;  %v1441_v2 = vmul.f32 %v3249_v21, %v4263_v32  ;;  %v2020_v32 = vld [vmem:[%s4335_s11] ss:$0 sm:$0xff]  ;;  %s3491_s11 = smov [#allocation16]  }
 0x81d   :  { %2807 = vmatprep.mubr.f32.mxu1 %v1454_v4  ;;  %v1440_v42 = vmul.f32 %v3251_v11, %v4266_v30  ;;  %s2001_s28 = sshll.u32 %s3491_s11, 4  ;;  %s2002_s28 = int_to_ptr.vmem [resolvable:$true] %s2001_s28 }
 0x81e   :  { %2808 = vmatmul.mubr.f32.gmra.mrb[68].mxu1 %v1455_v16  ;;  %v1457_v57 = vmax.f32 %v1441_v2, 0.0  ;;  %s3447_s1 = scalar_lea.vmem %s2002_s28, 2048  ;;  %p3452_p9 = scmp.lt.s32.totalorder %s2002_s28, %s2002_s28 }
 0x81f   :  { %v3253_v33 = vpop.eup %3252  ;;  %v1456_v27 = vmax.f32 %v1440_v42, 0.0  ;;  %p3448_p8 = scmp.ne.s32.totalorder %s2002_s28, %s3447_s1  ;;  %p3453_p10 = scmp.lt.s32.totalorder %s3447_s1, %s3447_s1 }
 0x820   :  { %v3255_v13 = vpop.eup %3254  ;;  %v1433_v31 = vmul.f32 %v3253_v33, %v4269_v20 }
 0x821   :  { %2810 = vmatprep.mubr.f32.mxu1 %v1456_v27  ;;  %v1432_v1 = vmul.f32 %v3255_v13, %v4274_v49  ;;  %p3454_p11 = por %p3453_p10, %p3452_p9 }
 0x822   :  { %2811 = vmatmul.mubr.f32.gmra.mrb[70].mxu1 %v1457_v57  ;;  %v1449_v25 = vmax.f32 %v1433_v31, 0.0 }
 0x823   :  { %v1448_v7 = vmax.f32 %v1432_v1, 0.0  ;;  %p3455_p12 = pnand %p3454_p11, %p3448_p8 }
 0x825   :  { %2798 = vmatprep.mubr.f32.mxu0 %v1448_v7 }
 0x826   :  { %2799 = vmatmul.mubr.f32.gmra.mrb[38].mxu0 %v1449_v25 }
 0x8d9   :  { %v2791_v30 = vpop.f32.mrb[32].mxu0 }
 0x8da   :  { %v1965_v24 = vadd.f32 %v2791_v30, %v2020_v32  ;;  %v1862_v53 = vpop.f32.mrb[33].mxu0 }
 0x8db   :  { %v1964_v10 = vadd.f32 %v2020_v32, %v1862_v53 }
 0x8dc   :  { %1981 = vst [vmem:[#allocation16 + $0x8] sm:$0xff] %v1965_v24 }
 0x8dd   :  { %1980 = vst [vmem:[#allocation16] sm:$0xff] %v1964_v10  ;;  %v2794_v44 = vpop.f32.mrb[34].mxu0 }
 0x8de   :  { %v1967_v20 = vadd.f32 %v2794_v44, %v2020_v32  ;;  %v1872_v54 = vpop.f32.mrb[35].mxu0 }
 0x8df   :  { %v1966_v45 = vadd.f32 %v2020_v32, %v1872_v54 }
 0x8e0   :  { %1983 = vst [vmem:[#allocation16 + $0x18] sm:$0xff] %v1967_v20 }
 0x8e1   :  { %1982 = vst [vmem:[#allocation16 + $0x10] sm:$0xff] %v1966_v45  ;;  %v2797_v49 = vpop.f32.mrb[36].mxu0 }
 0x8e2   :  { %v1969_v62 = vadd.f32 %v2797_v49, %v2020_v32  ;;  %v1882_v46 = vpop.f32.mrb[37].mxu0 }
 0x8e3   :  { %v1968_v26 = vadd.f32 %v2020_v32, %v1882_v46 }
 0x8e4   :  { %1985 = vst [vmem:[#allocation16 + $0x28] sm:$0xff] %v1969_v62 }
 0x8e5   :  { %1984 = vst [vmem:[#allocation16 + $0x20] sm:$0xff] %v1968_v26 }
 0x8e9   :  { %v2803_v52 = vpop.f32.mrb[64].mxu1 }
 0x8ea   :  { %v3117_v36 = vadd.f32 %v2803_v52, %v4181_v34  ;;  %v1902_v28 = vpop.f32.mrb[65].mxu1 }
 0x8eb   :  { %v3118_v29 = vadd.f32 %v1902_v28, %v4183_v63 }
 0x8ec   :  { %v1973_v59 = vadd.f32 %v3117_v36, %v2020_v32 }
 0x8ed   :  { %v1972_v39 = vadd.f32 %v3118_v29, %v2020_v32  ;;  %v2806_v22 = vpop.f32.mrb[66].mxu1 }
 0x8ee   :  { %1989 = vst [vmem:[#allocation16 + $0x48] sm:$0xff] %v1973_v59  ;;  %v3119_v43 = vadd.f32 %v2806_v22, %v4185_v5  ;;  %v1912_v12 = vpop.f32.mrb[67].mxu1 }
 0x8ef   :  { %1988 = vst [vmem:[#allocation16 + $0x40] sm:$0xff] %v1972_v39  ;;  %v3120_v37 = vadd.f32 %v1912_v12, %v4187_v41 }
 0x8f0   :  { %v1975_v50 = vadd.f32 %v3119_v43, %v2020_v32 }
 0x8f1   :  { %v1974_v18 = vadd.f32 %v3120_v37, %v2020_v32  ;;  %v2809_v56 = vpop.f32.mrb[68].mxu1 }
 0x8f2   :  { %1991 = vst [vmem:[#allocation16 + $0x58] sm:$0xff] %v1975_v50  ;;  %v3121_v55 = vadd.f32 %v2809_v56, %v4189_v58  ;;  %v1922_v34 = vpop.f32.mrb[69].mxu1 }
 0x8f3   :  { %1990 = vst [vmem:[#allocation16 + $0x50] sm:$0xff] %v1974_v18  ;;  %v3122_v63 = vadd.f32 %v1922_v34, %v4191_v8 }
 0x8f4   :  { %v1977_v0 = vadd.f32 %v3121_v55, %v2020_v32 }
 0x8f5   :  { %v1976_v60 = vadd.f32 %v3122_v63, %v2020_v32  ;;  %v2812_v15 = vpop.f32.mrb[70].mxu1 }
 0x8f6   :  { %1993 = vst [vmem:[#allocation16 + $0x68] sm:$0xff] %v1977_v0  ;;  %v3123_v5 = vadd.f32 %v2812_v15, %v4193_v35  ;;  %v1932_v40 = vpop.f32.mrb[71].mxu1 }
 0x8f7   :  { %1992 = vst [vmem:[#allocation16 + $0x60] sm:$0xff] %v1976_v60  ;;  %v3124_v41 = vadd.f32 %v1932_v40, %v4195_v14 }
 0x8f8   :  { %v1979_v48 = vadd.f32 %v3123_v5, %v2020_v32 }
 0x8f9   :  { %v1978_v3 = vadd.f32 %v3124_v41, %v2020_v32  ;;  %v2800_v38 = vpop.f32.mrb[38].mxu0 }
 0x8fa   :  { %1995 = vst [vmem:[#allocation16 + $0x78] sm:$0xff] %v1979_v48  ;;  %v1971_v58 = vadd.f32 %v2800_v38, %v2020_v32  ;;  %v1892_v9 = vpop.f32.mrb[39].mxu0 }
 0x8fb   :  { %1994 = vst [vmem:[#allocation16 + $0x70] sm:$0xff] %v1978_v3  ;;  %v1970_v8 = vadd.f32 %v2020_v32, %v1892_v9 }
 0x8fc   :  { %1987 = vst [vmem:[#allocation16 + $0x38] sm:$0xff] %v1971_v58 }
 0x8fd   :  { %1986 = vst [vmem:[#allocation16 + $0x30] sm:$0xff] %v1970_v8 }
 0x8fe   :  { %3458 = shalt.err (!%p3455_p12)
}
 0x8ff   :  { %s3459_s22 = scalar_lea.hbm %s4336_s12, 2048 }
 0x900   :  { %p3460_p13 = scmp.ne.s32.totalorder %s4336_s12, %s3459_s22  ;;  %p3463_p0 = scmp.lt.u32.totalorder %s3459_s22, %s4336_s12 }
 0x902   :  { %p3465_p1 = pnand %p3463_p0, %p3460_p13 }
 0x904   :  { %3468 = shalt.err (!%p3465_p1)
}
 0x905   :  { %2007 = dma.vmem_to_hbm [thread:$0]  %s2002_s28, 2048, %s4336_s12, [#allocation4], %s3483_s15, %s3483_s15, %s3484_s16  }
 0x906   :  { %3479 = dma.done.wait [#allocation4], 2048  }
 0x907   :  { %3480 = vsyncadd [#allocation4], 4294965248 }
 0x908   :  { %2011 = vsyncpa [#allocation3], 1 }
 0x909   :  { %2012 = vsyncpa [#allocation6], 1 }
 0x90a   :  { %2013 = vsyncpa [#allocation9], 1 }
 0x90b   :  { %2014 = vsyncpa [#allocation12], 1 }
 0x90c   :  { %2015 = vsyncpa [#allocation15], 1 }
 0x90d   :  { %2016 = vsyncpa [#allocation4], 1 }

</bundles_post_ra>
